<compile_context>
chip_gen: v6e
topology: v6e:2x2x1
jax: 0.10.0
libtpu: 0.0.40
codegen_flags: <defaults>
</compile_context>

<pallas_src>
import numpy as np
import jax
import jax.numpy as jnp
from jax.experimental import pallas as pl
from jax.experimental.pallas import tpu as pltpu

EPS = 1e-5    # nn.InstanceNorm3d default eps
N_TAPS = 27   # 3x3x3


def _tap_offsets(D, H, W):
    """(od, oh, ow) offsets and flattened-L shifts for every tap, PyTorch kd/kh/kw order."""
    HW = H * W
    offs, shifts = [], []
    for od in (-1, 0, 1):
        for oh in (-1, 0, 1):
            for ow in (-1, 0, 1):
                offs.append((od, oh, ow))
                shifts.append(od * HW + oh * W + ow)
    return offs, shifts


def _tap_masks(D, H, W):
    """(27, L) float32 validity masks for the pad=1 3x3x3 taps on the flattened L axis."""
    L = D * H * W
    l = np.arange(L)
    d_idx = l // (H * W)
    h_idx = (l // W) % H
    w_idx = l % W
    offs, _ = _tap_offsets(D, H, W)
    masks = np.zeros((N_TAPS, L), np.float32)
    for t, (od, oh, ow) in enumerate(offs):
        valid = ((d_idx + od >= 0) & (d_idx + od < D) &
                 (h_idx + oh >= 0) & (h_idx + oh < H) &
                 (w_idx + ow >= 0) & (w_idx + ow < W))
        masks[t] = valid
    return masks


def _make_resblock_kernel(num_layers, R, L, shifts):
    """R = b_tile * C rows per grid step (each row is one (batch, channel) volume)."""

    def kernel(x_ref, mask_ref, *args):
        w_refs = args[:num_layers]            # each (R, 27*R), block-diagonal over batch
        sum_ref = args[num_layers]             # (1, R, L) output: x + blocks(x)
        xprime_ref = args[num_layers + 1]      # (1, R, L) output: blocks(x)
        im2col_ref = args[num_layers + 2]      # (27*R, L) VMEM scratch

        x0 = x_ref[0]                          # (R, L) lane-dense activation
        h = x0
        for li in range(num_layers):
            # Fill the im2col scratch: one rolled + boundary-masked tap per 3x3x3 offset.
            for t, s in enumerate(shifts):
                if s == 0:
                    tap = h                    # center tap: mask is all ones
                else:
                    tap = pltpu.roll(h, shift=(-s) % L, axis=1) * mask_ref[t:t + 1, :]
                im2col_ref[t * R:(t + 1) * R, :] = tap
            # ONE stacked MXU matmul per layer: (R, 27R) x (27R, L) -> (R, L).
            acc = jnp.dot(w_refs[li][...], im2col_ref[...],
                          preferred_element_type=jnp.float32)
            # InstanceNorm3d (affine=False, track_running_stats=False): per-row
            # (= per batch, channel) stats over L, biased variance, eps inside rsqrt.
            mean = jnp.mean(acc, axis=1, keepdims=True)
            cen = acc - mean
            var = jnp.mean(cen * cen, axis=1, keepdims=True)
            h = jnp.maximum(cen * jax.lax.rsqrt(var + EPS), 0.0)   # ReLU

        xprime_ref[0] = h.astype(xprime_ref.dtype)                 # x_ = blocks(x)
        sum_ref[0] = (x0 + h).astype(sum_ref.dtype)                # x + x_

    return kernel


def resblock_forward(x_ncdhw, weights, b_tile=None):
    """ResBlock.forward: returns (x + blocks(x), blocks(x)), both NCDHW.

    weights: list of per-layer Conv3d weights in PyTorch layout (Cout, Cin, 3, 3, 3).
    """
    N, C, D, H, W = x_ncdhw.shape
    L = D * H * W
    num_layers = len(weights)
    for w in weights:
        # Residual add (and the fused per-row layout) require Cin == Cout == C.
        assert w.shape == (C, C, 3, 3, 3), w.shape

    if b_tile is None:
        # Pack 2 batch elements per grid step (fills all 8 f32 sublanes at C=4) as long
        # as >= 2 grid steps remain, so v7x's two TensorCores both get work; v5e/v6e
        # are single-TC so packing is pure win whenever N allows it.
        b_tile = 2 if (N % 2 == 0 and N // 2 >= 2 and 2 * C <= 8) else 1
    assert N % b_tile == 0
    G = N // b_tile
    R = b_tile * C

    _, shifts = _tap_offsets(D, H, W)
    masks = jnp.asarray(_tap_masks(D, H, W))               # (27, L), reused by all layers

    # Block-diagonal stacked weights: out row = b*C+co, col = t*R + b*C + ci; zeros off
    # the batch diagonal so packed batch elements never mix in the contraction.
    eye = jnp.eye(b_tile, dtype=jnp.float32)
    ws_bd = []
    for w in weights:
        w_taps = jnp.transpose(w, (2, 3, 4, 0, 1)).reshape(N_TAPS, C, C)   # (t, co, ci)
        ws_bd.append(jnp.einsum('toc,bB->botBc', w_taps, eye).reshape(R, N_TAPS * R))

    # NCDHW -> (G, b_tile*C, L): pure reshapes (channels-first => no transpose at all).
    x_packed = x_ncdhw.astype(jnp.float32).reshape(G, R, L)

    kernel = _make_resblock_kernel(num_layers, R, L, shifts)
    act_spec = pl.BlockSpec((1, R, L), lambda g: (g, 0, 0))
    mask_spec = pl.BlockSpec((N_TAPS, L), lambda g: (0, 0))
    w_spec = pl.BlockSpec((R, N_TAPS * R), lambda g: (0, 0))

    # Per-step VMEM (~0.6 MiB incl. the im2col scratch) is tiny on every generation, so
    # no vmem_limit_bytes / Buffered() tuning is needed at this size.
    # TODO(synk): for large volumes (e.g. 64^3) tile L with a one-depth-slab halo, use
    # two-pass (sum / sum-of-squares) InstanceNorm and bf16 activations so blocks stay
    # within v7x's 64 MiB VMEM.
    out_sum, out_xp = pl.pallas_call(
        kernel,
        out_shape=(jax.ShapeDtypeStruct((G, R, L), jnp.float32),
                   jax.ShapeDtypeStruct((G, R, L), jnp.float32)),
        grid=(G,),
        in_specs=[act_spec, mask_spec] + [w_spec] * num_layers,
        out_specs=(act_spec, act_spec),
        scratch_shapes=[pltpu.VMEM((N_TAPS * R, L), jnp.float32)],
        compiler_params=pltpu.CompilerParams(dimension_semantics=("parallel",)),
    )(x_packed, masks, *ws_bd)

    return (out_sum.reshape(N, C, D, H, W), out_xp.reshape(N, C, D, H, W))


def init_resblock_weights(key, in_channels, out_channels, num_layers):
    """Kaiming-normal (fan_in, gain=sqrt(2)) Conv3d weights, no bias (norm='instance').

    PyTorch layout per layer: (Cout, Cin, 3, 3, 3).
    """
    ws = []
    cin = in_channels
    for _ in range(num_layers):
        key, sub = jax.random.split(key)
        fan_in = cin * 27
        std = (2.0 / fan_in) ** 0.5
        ws.append(jax.random.normal(sub, (out_channels, cin, 3, 3, 3), jnp.float32) * std)
        cin = out_channels
    return ws


def resblock_ref(x, weights):
    """Pure-JAX/XLA reference of ResBlock.forward (conv -> instance-norm -> relu) x L + add."""
    h = x
    for w in weights:
        h = jax.lax.conv_general_dilated(
            h, w, window_strides=(1, 1, 1), padding=((1, 1), (1, 1), (1, 1)),
            dimension_numbers=('NCDHW', 'OIDHW', 'NCDHW'),
            precision=jax.lax.Precision.HIGHEST)
        mean = jnp.mean(h, axis=(2, 3, 4), keepdims=True)
        var = jnp.mean((h - mean) ** 2, axis=(2, 3, 4), keepdims=True)
        h = jnp.maximum((h - mean) * jax.lax.rsqrt(var + EPS), 0.0)
    return x + h, h


if __name__ == "__main__":
    # Module config
    in_channels, out_channels, num_layers = 4, 4, 2

    key = jax.random.PRNGKey(0)
    kx, kw = jax.random.split(key)

    # PyTorch-convention input: NCDHW. N=4 exercises the packed (2 batch / step) path
    # while keeping 2 grid steps for v7x's two TensorCores.
    N, C, D, H, W = 4, in_channels, 8, 8, 8
    x = jax.random.normal(kx, (N, C, D, H, W), jnp.float32)

    weights = init_resblock_weights(kw, in_channels, out_channels, num_layers)

    fwd = jax.jit(lambda inp: resblock_forward(inp, weights))
    out_sum, out_xp = fwd(x)
    jax.block_until_ready((out_sum, out_xp))

    assert out_sum.shape == (N, out_channels, D, H, W)
    assert out_xp.shape == (N, out_channels, D, H, W)

    # Correctness check against the pure-XLA reference.
    ref_sum, ref_xp = resblock_ref(x, weights)
    np.testing.assert_allclose(np.asarray(out_xp), np.asarray(ref_xp), rtol=1e-2, atol=1e-2)
    np.testing.assert_allclose(np.asarray(out_sum), np.asarray(ref_sum), rtol=1e-2, atol=1e-2)

    print("KERNEL_OK")
</pallas_src>

<mosaic_0001>
module attributes {stable_mosaic.version = 11 : i64} {
  func.func @kernel(%arg0: i32, %arg1: memref<1x8x512xf32, #tpu.memory_space<vmem>>, %arg2: memref<27x512xf32, #tpu.memory_space<vmem>>, %arg3: memref<8x216xf32, #tpu.memory_space<vmem>>, %arg4: memref<8x216xf32, #tpu.memory_space<vmem>>, %arg5: memref<1x8x512xf32, #tpu.memory_space<vmem>>, %arg6: memref<1x8x512xf32, #tpu.memory_space<vmem>>, %arg7: memref<216x512xf32, #tpu.memory_space<vmem>>) attributes {dimension_semantics = [#tpu.dimension_semantics<parallel>], iteration_bounds = array<i64: 2>, scalar_prefetch = 0 : i64, scratch_operands = 1 : i64, tpu.core_type = #tpu.core_type<tc>, window_params = [{transform_indices = @transform_0, window_bounds = array<i64: 1, 8, 512>}, {pipeline_mode = #tpu.pipeline_mode<synchronous>, transform_indices = @transform_1, window_bounds = array<i64: 27, 512>}, {pipeline_mode = #tpu.pipeline_mode<synchronous>, transform_indices = @transform_2, window_bounds = array<i64: 8, 216>}, {pipeline_mode = #tpu.pipeline_mode<synchronous>, transform_indices = @transform_3, window_bounds = array<i64: 8, 216>}, {transform_indices = @transform_4, window_bounds = array<i64: 1, 8, 512>}, {transform_indices = @transform_5, window_bounds = array<i64: 1, 8, 512>}]} {
    %c0 = arith.constant 0 : index
    %c0_0 = arith.constant 0 : index
    %c0_1 = arith.constant 0 : index
    %0 = vector.load %arg1[%c0, %c0_0, %c0_1] : memref<1x8x512xf32, #tpu.memory_space<vmem>>, vector<1x8x512xf32>
    %1 = vector.shape_cast %0 : vector<1x8x512xf32> to vector<8x512xf32>
    %c73_i32 = arith.constant 73 : i32
    %2 = tpu.dynamic_rotate %1 by %c73_i32 dim 1 : vector<8x512xf32>, i32 -> vector<8x512xf32>
    %c0_2 = arith.constant 0 : index
    %c0_3 = arith.constant 0 : index
    %3 = vector.load %arg2[%c0_2, %c0_3] : memref<27x512xf32, #tpu.memory_space<vmem>>, vector<1x512xf32>
    %4 = vector.broadcast %3 : vector<1x512xf32> to vector<8x512xf32>
    %5 = arith.mulf %2, %4 : vector<8x512xf32>
    %c0_4 = arith.constant 0 : index
    %c0_5 = arith.constant 0 : index
    %6 = vector.load %arg7[%c0_4, %c0_5] : memref<216x512xf32, #tpu.memory_space<vmem>>, vector<8x512xf32>
    tpu.vector_store %arg7[%c0_4, %c0_5], %5 {strides = array<i32>} : memref<216x512xf32, #tpu.memory_space<vmem>>, vector<8x512xf32>,
    %c72_i32 = arith.constant 72 : i32
    %7 = tpu.dynamic_rotate %1 by %c72_i32 dim 1 : vector<8x512xf32>, i32 -> vector<8x512xf32>
    %c1 = arith.constant 1 : index
    %c0_6 = arith.constant 0 : index
    %8 = vector.load %arg2[%c1, %c0_6] : memref<27x512xf32, #tpu.memory_space<vmem>>, vector<1x512xf32>
    %9 = vector.broadcast %8 : vector<1x512xf32> to vector<8x512xf32>
    %10 = arith.mulf %7, %9 : vector<8x512xf32>
    %c8 = arith.constant 8 : index
    %c0_7 = arith.constant 0 : index
    %11 = vector.load %arg7[%c8, %c0_7] : memref<216x512xf32, #tpu.memory_space<vmem>>, vector<8x512xf32>
    tpu.vector_store %arg7[%c8, %c0_7], %10 {strides = array<i32>} : memref<216x512xf32, #tpu.memory_space<vmem>>, vector<8x512xf32>,
    %c71_i32 = arith.constant 71 : i32
    %12 = tpu.dynamic_rotate %1 by %c71_i32 dim 1 : vector<8x512xf32>, i32 -> vector<8x512xf32>
    %c2 = arith.constant 2 : index
    %c0_8 = arith.constant 0 : index
    %13 = vector.load %arg2[%c2, %c0_8] : memref<27x512xf32, #tpu.memory_space<vmem>>, vector<1x512xf32>
    %14 = vector.broadcast %13 : vector<1x512xf32> to vector<8x512xf32>
    %15 = arith.mulf %12, %14 : vector<8x512xf32>
    %c16 = arith.constant 16 : index
    %c0_9 = arith.constant 0 : index
    %16 = vector.load %arg7[%c16, %c0_9] : memref<216x512xf32, #tpu.memory_space<vmem>>, vector<8x512xf32>
    tpu.vector_store %arg7[%c16, %c0_9], %15 {strides = array<i32>} : memref<216x512xf32, #tpu.memory_space<vmem>>, vector<8x512xf32>,
    %c65_i32 = arith.constant 65 : i32
    %17 = tpu.dynamic_rotate %1 by %c65_i32 dim 1 : vector<8x512xf32>, i32 -> vector<8x512xf32>
    %c3 = arith.constant 3 : index
    %c0_10 = arith.constant 0 : index
    %18 = vector.load %arg2[%c3, %c0_10] : memref<27x512xf32, #tpu.memory_space<vmem>>, vector<1x512xf32>
    %19 = vector.broadcast %18 : vector<1x512xf32> to vector<8x512xf32>
    %20 = arith.mulf %17, %19 : vector<8x512xf32>
    %c24 = arith.constant 24 : index
    %c0_11 = arith.constant 0 : index
    %21 = vector.load %arg7[%c24, %c0_11] : memref<216x512xf32, #tpu.memory_space<vmem>>, vector<8x512xf32>
    tpu.vector_store %arg7[%c24, %c0_11], %20 {strides = array<i32>} : memref<216x512xf32, #tpu.memory_space<vmem>>, vector<8x512xf32>,
    %c64_i32 = arith.constant 64 : i32
    %22 = tpu.dynamic_rotate %1 by %c64_i32 dim 1 : vector<8x512xf32>, i32 -> vector<8x512xf32>
    %c4 = arith.constant 4 : index
    %c0_12 = arith.constant 0 : index
    %23 = vector.load %arg2[%c4, %c0_12] : memref<27x512xf32, #tpu.memory_space<vmem>>, vector<1x512xf32>
    %24 = vector.broadcast %23 : vector<1x512xf32> to vector<8x512xf32>
    %25 = arith.mulf %22, %24 : vector<8x512xf32>
    %c32 = arith.constant 32 : index
    %c0_13 = arith.constant 0 : index
    %26 = vector.load %arg7[%c32, %c0_13] : memref<216x512xf32, #tpu.memory_space<vmem>>, vector<8x512xf32>
    tpu.vector_store %arg7[%c32, %c0_13], %25 {strides = array<i32>} : memref<216x512xf32, #tpu.memory_space<vmem>>, vector<8x512xf32>,
    %c63_i32 = arith.constant 63 : i32
    %27 = tpu.dynamic_rotate %1 by %c63_i32 dim 1 : vector<8x512xf32>, i32 -> vector<8x512xf32>
    %c5 = arith.constant 5 : index
    %c0_14 = arith.constant 0 : index
    %28 = vector.load %arg2[%c5, %c0_14] : memref<27x512xf32, #tpu.memory_space<vmem>>, vector<1x512xf32>
    %29 = vector.broadcast %28 : vector<1x512xf32> to vector<8x512xf32>
    %30 = arith.mulf %27, %29 : vector<8x512xf32>
    %c40 = arith.constant 40 : index
    %c0_15 = arith.constant 0 : index
    %31 = vector.load %arg7[%c40, %c0_15] : memref<216x512xf32, #tpu.memory_space<vmem>>, vector<8x512xf32>
    tpu.vector_store %arg7[%c40, %c0_15], %30 {strides = array<i32>} : memref<216x512xf32, #tpu.memory_space<vmem>>, vector<8x512xf32>,
    %c57_i32 = arith.constant 57 : i32
    %32 = tpu.dynamic_rotate %1 by %c57_i32 dim 1 : vector<8x512xf32>, i32 -> vector<8x512xf32>
    %c6 = arith.constant 6 : index
    %c0_16 = arith.constant 0 : index
    %33 = vector.load %arg2[%c6, %c0_16] : memref<27x512xf32, #tpu.memory_space<vmem>>, vector<1x512xf32>
    %34 = vector.broadcast %33 : vector<1x512xf32> to vector<8x512xf32>
    %35 = arith.mulf %32, %34 : vector<8x512xf32>
    %c48 = arith.constant 48 : index
    %c0_17 = arith.constant 0 : index
    %36 = vector.load %arg7[%c48, %c0_17] : memref<216x512xf32, #tpu.memory_space<vmem>>, vector<8x512xf32>
    tpu.vector_store %arg7[%c48, %c0_17], %35 {strides = array<i32>} : memref<216x512xf32, #tpu.memory_space<vmem>>, vector<8x512xf32>,
    %c56_i32 = arith.constant 56 : i32
    %37 = tpu.dynamic_rotate %1 by %c56_i32 dim 1 : vector<8x512xf32>, i32 -> vector<8x512xf32>
    %c7 = arith.constant 7 : index
    %c0_18 = arith.constant 0 : index
    %38 = vector.load %arg2[%c7, %c0_18] : memref<27x512xf32, #tpu.memory_space<vmem>>, vector<1x512xf32>
    %39 = vector.broadcast %38 : vector<1x512xf32> to vector<8x512xf32>
    %40 = arith.mulf %37, %39 : vector<8x512xf32>
    %c56 = arith.constant 56 : index
    %c0_19 = arith.constant 0 : index
    %41 = vector.load %arg7[%c56, %c0_19] : memref<216x512xf32, #tpu.memory_space<vmem>>, vector<8x512xf32>
    tpu.vector_store %arg7[%c56, %c0_19], %40 {strides = array<i32>} : memref<216x512xf32, #tpu.memory_space<vmem>>, vector<8x512xf32>,
    %c55_i32 = arith.constant 55 : i32
    %42 = tpu.dynamic_rotate %1 by %c55_i32 dim 1 : vector<8x512xf32>, i32 -> vector<8x512xf32>
    %c8_20 = arith.constant 8 : index
    %c0_21 = arith.constant 0 : index
    %43 = vector.load %arg2[%c8_20, %c0_21] : memref<27x512xf32, #tpu.memory_space<vmem>>, vector<1x512xf32>
    %44 = vector.broadcast %43 : vector<1x512xf32> to vector<8x512xf32>
    %45 = arith.mulf %42, %44 : vector<8x512xf32>
    %c64 = arith.constant 64 : index
    %c0_22 = arith.constant 0 : index
    %46 = vector.load %arg7[%c64, %c0_22] : memref<216x512xf32, #tpu.memory_space<vmem>>, vector<8x512xf32>
    tpu.vector_store %arg7[%c64, %c0_22], %45 {strides = array<i32>} : memref<216x512xf32, #tpu.memory_space<vmem>>, vector<8x512xf32>,
    %c9_i32 = arith.constant 9 : i32
    %47 = tpu.dynamic_rotate %1 by %c9_i32 dim 1 : vector<8x512xf32>, i32 -> vector<8x512xf32>
    %c9 = arith.constant 9 : index
    %c0_23 = arith.constant 0 : index
    %48 = vector.load %arg2[%c9, %c0_23] : memref<27x512xf32, #tpu.memory_space<vmem>>, vector<1x512xf32>
    %49 = vector.broadcast %48 : vector<1x512xf32> to vector<8x512xf32>
    %50 = arith.mulf %47, %49 : vector<8x512xf32>
    %c72 = arith.constant 72 : index
    %c0_24 = arith.constant 0 : index
    %51 = vector.load %arg7[%c72, %c0_24] : memref<216x512xf32, #tpu.memory_space<vmem>>, vector<8x512xf32>
    tpu.vector_store %arg7[%c72, %c0_24], %50 {strides = array<i32>} : memref<216x512xf32, #tpu.memory_space<vmem>>, vector<8x512xf32>,
    %c8_i32 = arith.constant 8 : i32
    %52 = tpu.dynamic_rotate %1 by %c8_i32 dim 1 : vector<8x512xf32>, i32 -> vector<8x512xf32>
    %c10 = arith.constant 10 : index
    %c0_25 = arith.constant 0 : index
    %53 = vector.load %arg2[%c10, %c0_25] : memref<27x512xf32, #tpu.memory_space<vmem>>, vector<1x512xf32>
    %54 = vector.broadcast %53 : vector<1x512xf32> to vector<8x512xf32>
    %55 = arith.mulf %52, %54 : vector<8x512xf32>
    %c80 = arith.constant 80 : index
    %c0_26 = arith.constant 0 : index
    %56 = vector.load %arg7[%c80, %c0_26] : memref<216x512xf32, #tpu.memory_space<vmem>>, vector<8x512xf32>
    tpu.vector_store %arg7[%c80, %c0_26], %55 {strides = array<i32>} : memref<216x512xf32, #tpu.memory_space<vmem>>, vector<8x512xf32>,
    %c7_i32 = arith.constant 7 : i32
    %57 = tpu.dynamic_rotate %1 by %c7_i32 dim 1 : vector<8x512xf32>, i32 -> vector<8x512xf32>
    %c11 = arith.constant 11 : index
    %c0_27 = arith.constant 0 : index
    %58 = vector.load %arg2[%c11, %c0_27] : memref<27x512xf32, #tpu.memory_space<vmem>>, vector<1x512xf32>
    %59 = vector.broadcast %58 : vector<1x512xf32> to vector<8x512xf32>
    %60 = arith.mulf %57, %59 : vector<8x512xf32>
    %c88 = arith.constant 88 : index
    %c0_28 = arith.constant 0 : index
    %61 = vector.load %arg7[%c88, %c0_28] : memref<216x512xf32, #tpu.memory_space<vmem>>, vector<8x512xf32>
    tpu.vector_store %arg7[%c88, %c0_28], %60 {strides = array<i32>} : memref<216x512xf32, #tpu.memory_space<vmem>>, vector<8x512xf32>,
    %c1_i32 = arith.constant 1 : i32
    %62 = tpu.dynamic_rotate %1 by %c1_i32 dim 1 : vector<8x512xf32>, i32 -> vector<8x512xf32>
    %c12 = arith.constant 12 : index
    %c0_29 = arith.constant 0 : index
    %63 = vector.load %arg2[%c12, %c0_29] : memref<27x512xf32, #tpu.memory_space<vmem>>, vector<1x512xf32>
    %64 = vector.broadcast %63 : vector<1x512xf32> to vector<8x512xf32>
    %65 = arith.mulf %62, %64 : vector<8x512xf32>
    %c96 = arith.constant 96 : index
    %c0_30 = arith.constant 0 : index
    %66 = vector.load %arg7[%c96, %c0_30] : memref<216x512xf32, #tpu.memory_space<vmem>>, vector<8x512xf32>
    tpu.vector_store %arg7[%c96, %c0_30], %65 {strides = array<i32>} : memref<216x512xf32, #tpu.memory_space<vmem>>, vector<8x512xf32>,
    %c104 = arith.constant 104 : index
    %c0_31 = arith.constant 0 : index
    %67 = vector.load %arg7[%c104, %c0_31] : memref<216x512xf32, #tpu.memory_space<vmem>>, vector<8x512xf32>
    tpu.vector_store %arg7[%c104, %c0_31], %1 {strides = array<i32>} : memref<216x512xf32, #tpu.memory_space<vmem>>, vector<8x512xf32>,
    %c511_i32 = arith.constant 511 : i32
    %68 = tpu.dynamic_rotate %1 by %c511_i32 dim 1 : vector<8x512xf32>, i32 -> vector<8x512xf32>
    %c14 = arith.constant 14 : index
    %c0_32 = arith.constant 0 : index
    %69 = vector.load %arg2[%c14, %c0_32] : memref<27x512xf32, #tpu.memory_space<vmem>>, vector<1x512xf32>
    %70 = vector.broadcast %69 : vector<1x512xf32> to vector<8x512xf32>
    %71 = arith.mulf %68, %70 : vector<8x512xf32>
    %c112 = arith.constant 112 : index
    %c0_33 = arith.constant 0 : index
    %72 = vector.load %arg7[%c112, %c0_33] : memref<216x512xf32, #tpu.memory_space<vmem>>, vector<8x512xf32>
    tpu.vector_store %arg7[%c112, %c0_33], %71 {strides = array<i32>} : memref<216x512xf32, #tpu.memory_space<vmem>>, vector<8x512xf32>,
    %c505_i32 = arith.constant 505 : i32
    %73 = tpu.dynamic_rotate %1 by %c505_i32 dim 1 : vector<8x512xf32>, i32 -> vector<8x512xf32>
    %c15 = arith.constant 15 : index
    %c0_34 = arith.constant 0 : index
    %74 = vector.load %arg2[%c15, %c0_34] : memref<27x512xf32, #tpu.memory_space<vmem>>, vector<1x512xf32>
    %75 = vector.broadcast %74 : vector<1x512xf32> to vector<8x512xf32>
    %76 = arith.mulf %73, %75 : vector<8x512xf32>
    %c120 = arith.constant 120 : index
    %c0_35 = arith.constant 0 : index
    %77 = vector.load %arg7[%c120, %c0_35] : memref<216x512xf32, #tpu.memory_space<vmem>>, vector<8x512xf32>
    tpu.vector_store %arg7[%c120, %c0_35], %76 {strides = array<i32>} : memref<216x512xf32, #tpu.memory_space<vmem>>, vector<8x512xf32>,
    %c504_i32 = arith.constant 504 : i32
    %78 = tpu.dynamic_rotate %1 by %c504_i32 dim 1 : vector<8x512xf32>, i32 -> vector<8x512xf32>
    %c16_36 = arith.constant 16 : index
    %c0_37 = arith.constant 0 : index
    %79 = vector.load %arg2[%c16_36, %c0_37] : memref<27x512xf32, #tpu.memory_space<vmem>>, vector<1x512xf32>
    %80 = vector.broadcast %79 : vector<1x512xf32> to vector<8x512xf32>
    %81 = arith.mulf %78, %80 : vector<8x512xf32>
    %c128 = arith.constant 128 : index
    %c0_38 = arith.constant 0 : index
    %82 = vector.load %arg7[%c128, %c0_38] : memref<216x512xf32, #tpu.memory_space<vmem>>, vector<8x512xf32>
    tpu.vector_store %arg7[%c128, %c0_38], %81 {strides = array<i32>} : memref<216x512xf32, #tpu.memory_space<vmem>>, vector<8x512xf32>,
    %c503_i32 = arith.constant 503 : i32
    %83 = tpu.dynamic_rotate %1 by %c503_i32 dim 1 : vector<8x512xf32>, i32 -> vector<8x512xf32>
    %c17 = arith.constant 17 : index
    %c0_39 = arith.constant 0 : index
    %84 = vector.load %arg2[%c17, %c0_39] : memref<27x512xf32, #tpu.memory_space<vmem>>, vector<1x512xf32>
    %85 = vector.broadcast %84 : vector<1x512xf32> to vector<8x512xf32>
    %86 = arith.mulf %83, %85 : vector<8x512xf32>
    %c136 = arith.constant 136 : index
    %c0_40 = arith.constant 0 : index
    %87 = vector.load %arg7[%c136, %c0_40] : memref<216x512xf32, #tpu.memory_space<vmem>>, vector<8x512xf32>
    tpu.vector_store %arg7[%c136, %c0_40], %86 {strides = array<i32>} : memref<216x512xf32, #tpu.memory_space<vmem>>, vector<8x512xf32>,
    %c457_i32 = arith.constant 457 : i32
    %88 = tpu.dynamic_rotate %1 by %c457_i32 dim 1 : vector<8x512xf32>, i32 -> vector<8x512xf32>
    %c18 = arith.constant 18 : index
    %c0_41 = arith.constant 0 : index
    %89 = vector.load %arg2[%c18, %c0_41] : memref<27x512xf32, #tpu.memory_space<vmem>>, vector<1x512xf32>
    %90 = vector.broadcast %89 : vector<1x512xf32> to vector<8x512xf32>
    %91 = arith.mulf %88, %90 : vector<8x512xf32>
    %c144 = arith.constant 144 : index
    %c0_42 = arith.constant 0 : index
    %92 = vector.load %arg7[%c144, %c0_42] : memref<216x512xf32, #tpu.memory_space<vmem>>, vector<8x512xf32>
    tpu.vector_store %arg7[%c144, %c0_42], %91 {strides = array<i32>} : memref<216x512xf32, #tpu.memory_space<vmem>>, vector<8x512xf32>,
    %c456_i32 = arith.constant 456 : i32
    %93 = tpu.dynamic_rotate %1 by %c456_i32 dim 1 : vector<8x512xf32>, i32 -> vector<8x512xf32>
    %c19 = arith.constant 19 : index
    %c0_43 = arith.constant 0 : index
    %94 = vector.load %arg2[%c19, %c0_43] : memref<27x512xf32, #tpu.memory_space<vmem>>, vector<1x512xf32>
    %95 = vector.broadcast %94 : vector<1x512xf32> to vector<8x512xf32>
    %96 = arith.mulf %93, %95 : vector<8x512xf32>
    %c152 = arith.constant 152 : index
    %c0_44 = arith.constant 0 : index
    %97 = vector.load %arg7[%c152, %c0_44] : memref<216x512xf32, #tpu.memory_space<vmem>>, vector<8x512xf32>
    tpu.vector_store %arg7[%c152, %c0_44], %96 {strides = array<i32>} : memref<216x512xf32, #tpu.memory_space<vmem>>, vector<8x512xf32>,
    %c455_i32 = arith.constant 455 : i32
    %98 = tpu.dynamic_rotate %1 by %c455_i32 dim 1 : vector<8x512xf32>, i32 -> vector<8x512xf32>
    %c20 = arith.constant 20 : index
    %c0_45 = arith.constant 0 : index
    %99 = vector.load %arg2[%c20, %c0_45] : memref<27x512xf32, #tpu.memory_space<vmem>>, vector<1x512xf32>
    %100 = vector.broadcast %99 : vector<1x512xf32> to vector<8x512xf32>
    %101 = arith.mulf %98, %100 : vector<8x512xf32>
    %c160 = arith.constant 160 : index
    %c0_46 = arith.constant 0 : index
    %102 = vector.load %arg7[%c160, %c0_46] : memref<216x512xf32, #tpu.memory_space<vmem>>, vector<8x512xf32>
    tpu.vector_store %arg7[%c160, %c0_46], %101 {strides = array<i32>} : memref<216x512xf32, #tpu.memory_space<vmem>>, vector<8x512xf32>,
    %c449_i32 = arith.constant 449 : i32
    %103 = tpu.dynamic_rotate %1 by %c449_i32 dim 1 : vector<8x512xf32>, i32 -> vector<8x512xf32>
    %c21 = arith.constant 21 : index
    %c0_47 = arith.constant 0 : index
    %104 = vector.load %arg2[%c21, %c0_47] : memref<27x512xf32, #tpu.memory_space<vmem>>, vector<1x512xf32>
    %105 = vector.broadcast %104 : vector<1x512xf32> to vector<8x512xf32>
    %106 = arith.mulf %103, %105 : vector<8x512xf32>
    %c168 = arith.constant 168 : index
    %c0_48 = arith.constant 0 : index
    %107 = vector.load %arg7[%c168, %c0_48] : memref<216x512xf32, #tpu.memory_space<vmem>>, vector<8x512xf32>
    tpu.vector_store %arg7[%c168, %c0_48], %106 {strides = array<i32>} : memref<216x512xf32, #tpu.memory_space<vmem>>, vector<8x512xf32>,
    %c448_i32 = arith.constant 448 : i32
    %108 = tpu.dynamic_rotate %1 by %c448_i32 dim 1 : vector<8x512xf32>, i32 -> vector<8x512xf32>
    %c22 = arith.constant 22 : index
    %c0_49 = arith.constant 0 : index
    %109 = vector.load %arg2[%c22, %c0_49] : memref<27x512xf32, #tpu.memory_space<vmem>>, vector<1x512xf32>
    %110 = vector.broadcast %109 : vector<1x512xf32> to vector<8x512xf32>
    %111 = arith.mulf %108, %110 : vector<8x512xf32>
    %c176 = arith.constant 176 : index
    %c0_50 = arith.constant 0 : index
    %112 = vector.load %arg7[%c176, %c0_50] : memref<216x512xf32, #tpu.memory_space<vmem>>, vector<8x512xf32>
    tpu.vector_store %arg7[%c176, %c0_50], %111 {strides = array<i32>} : memref<216x512xf32, #tpu.memory_space<vmem>>, vector<8x512xf32>,
    %c447_i32 = arith.constant 447 : i32
    %113 = tpu.dynamic_rotate %1 by %c447_i32 dim 1 : vector<8x512xf32>, i32 -> vector<8x512xf32>
    %c23 = arith.constant 23 : index
    %c0_51 = arith.constant 0 : index
    %114 = vector.load %arg2[%c23, %c0_51] : memref<27x512xf32, #tpu.memory_space<vmem>>, vector<1x512xf32>
    %115 = vector.broadcast %114 : vector<1x512xf32> to vector<8x512xf32>
    %116 = arith.mulf %113, %115 : vector<8x512xf32>
    %c184 = arith.constant 184 : index
    %c0_52 = arith.constant 0 : index
    %117 = vector.load %arg7[%c184, %c0_52] : memref<216x512xf32, #tpu.memory_space<vmem>>, vector<8x512xf32>
    tpu.vector_store %arg7[%c184, %c0_52], %116 {strides = array<i32>} : memref<216x512xf32, #tpu.memory_space<vmem>>, vector<8x512xf32>,
    %c441_i32 = arith.constant 441 : i32
    %118 = tpu.dynamic_rotate %1 by %c441_i32 dim 1 : vector<8x512xf32>, i32 -> vector<8x512xf32>
    %c24_53 = arith.constant 24 : index
    %c0_54 = arith.constant 0 : index
    %119 = vector.load %arg2[%c24_53, %c0_54] : memref<27x512xf32, #tpu.memory_space<vmem>>, vector<1x512xf32>
    %120 = vector.broadcast %119 : vector<1x512xf32> to vector<8x512xf32>
    %121 = arith.mulf %118, %120 : vector<8x512xf32>
    %c192 = arith.constant 192 : index
    %c0_55 = arith.constant 0 : index
    %122 = vector.load %arg7[%c192, %c0_55] : memref<216x512xf32, #tpu.memory_space<vmem>>, vector<8x512xf32>
    tpu.vector_store %arg7[%c192, %c0_55], %121 {strides = array<i32>} : memref<216x512xf32, #tpu.memory_space<vmem>>, vector<8x512xf32>,
    %c440_i32 = arith.constant 440 : i32
    %123 = tpu.dynamic_rotate %1 by %c440_i32 dim 1 : vector<8x512xf32>, i32 -> vector<8x512xf32>
    %c25 = arith.constant 25 : index
    %c0_56 = arith.constant 0 : index
    %124 = vector.load %arg2[%c25, %c0_56] : memref<27x512xf32, #tpu.memory_space<vmem>>, vector<1x512xf32>
    %125 = vector.broadcast %124 : vector<1x512xf32> to vector<8x512xf32>
    %126 = arith.mulf %123, %125 : vector<8x512xf32>
    %c200 = arith.constant 200 : index
    %c0_57 = arith.constant 0 : index
    %127 = vector.load %arg7[%c200, %c0_57] : memref<216x512xf32, #tpu.memory_space<vmem>>, vector<8x512xf32>
    tpu.vector_store %arg7[%c200, %c0_57], %126 {strides = array<i32>} : memref<216x512xf32, #tpu.memory_space<vmem>>, vector<8x512xf32>,
    %c439_i32 = arith.constant 439 : i32
    %128 = tpu.dynamic_rotate %1 by %c439_i32 dim 1 : vector<8x512xf32>, i32 -> vector<8x512xf32>
    %c26 = arith.constant 26 : index
    %c0_58 = arith.constant 0 : index
    %129 = vector.load %arg2[%c26, %c0_58] : memref<27x512xf32, #tpu.memory_space<vmem>>, vector<1x512xf32>
    %130 = vector.broadcast %129 : vector<1x512xf32> to vector<8x512xf32>
    %131 = arith.mulf %128, %130 : vector<8x512xf32>
    %c208 = arith.constant 208 : index
    %c0_59 = arith.constant 0 : index
    %132 = vector.load %arg7[%c208, %c0_59] : memref<216x512xf32, #tpu.memory_space<vmem>>, vector<8x512xf32>
    tpu.vector_store %arg7[%c208, %c0_59], %131 {strides = array<i32>} : memref<216x512xf32, #tpu.memory_space<vmem>>, vector<8x512xf32>,
    %c0_60 = arith.constant 0 : index
    %c0_61 = arith.constant 0 : index
    %133 = vector.load %arg3[%c0_60, %c0_61] : memref<8x216xf32, #tpu.memory_space<vmem>>, vector<8x216xf32>
    %c0_62 = arith.constant 0 : index
    %c0_63 = arith.constant 0 : index
    %134 = vector.load %arg7[%c0_62, %c0_63] : memref<216x512xf32, #tpu.memory_space<vmem>>, vector<216x512xf32>
    %cst = arith.constant dense<0.000000e+00> : vector<8x512xf32>
    %135 = tpu.matmul %133, %134, %cst {dimension_numbers = #tpu.dot_dimension_numbers<[1], [0], [0], [1], [0, 0, 1, 1], [], []>} : vector<8x216xf32>, vector<216x512xf32>, vector<8x512xf32> -> vector<8x512xf32>
    %cst_64 = arith.constant dense<0.000000e+00> : vector<8xf32>
    %136 = vector.multi_reduction <add>, %135, %cst_64 [1] : vector<8x512xf32> to vector<8xf32>
    %137 = vector.shape_cast %136 : vector<8xf32> to vector<8x1xf32>
    %cst_65 = arith.constant 5.120000e+02 : f32
    %138 = vector.broadcast %cst_65 : f32 to vector<8x1xf32>
    %139 = arith.divf %137, %138 : vector<8x1xf32>
    %140 = vector.broadcast %139 : vector<8x1xf32> to vector<8x512xf32>
    %141 = arith.subf %135, %140 : vector<8x512xf32>
    %142 = arith.mulf %141, %141 : vector<8x512xf32>
    %cst_66 = arith.constant dense<0.000000e+00> : vector<8xf32>
    %143 = vector.multi_reduction <add>, %142, %cst_66 [1] : vector<8x512xf32> to vector<8xf32>
    %144 = vector.shape_cast %143 : vector<8xf32> to vector<8x1xf32>
    %cst_67 = arith.constant 5.120000e+02 : f32
    %145 = vector.broadcast %cst_67 : f32 to vector<8x1xf32>
    %146 = arith.divf %144, %145 : vector<8x1xf32>
    %cst_68 = arith.constant 9.99999974E-6 : f32
    %147 = vector.broadcast %cst_68 : f32 to vector<8x1xf32>
    %148 = arith.addf %146, %147 : vector<8x1xf32>
    %149 = math.rsqrt %148 : vector<8x1xf32>
    %150 = vector.broadcast %149 : vector<8x1xf32> to vector<8x512xf32>
    %151 = arith.mulf %141, %150 : vector<8x512xf32>
    %cst_69 = arith.constant 0.000000e+00 : f32
    %152 = vector.broadcast %cst_69 : f32 to vector<8x512xf32>
    %153 = arith.maximumf %151, %152 : vector<8x512xf32>
    %c73_i32_70 = arith.constant 73 : i32
    %154 = tpu.dynamic_rotate %153 by %c73_i32_70 dim 1 : vector<8x512xf32>, i32 -> vector<8x512xf32>
    %c0_71 = arith.constant 0 : index
    %c0_72 = arith.constant 0 : index
    %155 = vector.load %arg2[%c0_71, %c0_72] : memref<27x512xf32, #tpu.memory_space<vmem>>, vector<1x512xf32>
    %156 = vector.broadcast %155 : vector<1x512xf32> to vector<8x512xf32>
    %157 = arith.mulf %154, %156 : vector<8x512xf32>
    %c0_73 = arith.constant 0 : index
    %c0_74 = arith.constant 0 : index
    %158 = vector.load %arg7[%c0_73, %c0_74] : memref<216x512xf32, #tpu.memory_space<vmem>>, vector<8x512xf32>
    tpu.vector_store %arg7[%c0_73, %c0_74], %157 {strides = array<i32>} : memref<216x512xf32, #tpu.memory_space<vmem>>, vector<8x512xf32>,
    %c72_i32_75 = arith.constant 72 : i32
    %159 = tpu.dynamic_rotate %153 by %c72_i32_75 dim 1 : vector<8x512xf32>, i32 -> vector<8x512xf32>
    %c1_76 = arith.constant 1 : index
    %c0_77 = arith.constant 0 : index
    %160 = vector.load %arg2[%c1_76, %c0_77] : memref<27x512xf32, #tpu.memory_space<vmem>>, vector<1x512xf32>
    %161 = vector.broadcast %160 : vector<1x512xf32> to vector<8x512xf32>
    %162 = arith.mulf %159, %161 : vector<8x512xf32>
    %c8_78 = arith.constant 8 : index
    %c0_79 = arith.constant 0 : index
    %163 = vector.load %arg7[%c8_78, %c0_79] : memref<216x512xf32, #tpu.memory_space<vmem>>, vector<8x512xf32>
    tpu.vector_store %arg7[%c8_78, %c0_79], %162 {strides = array<i32>} : memref<216x512xf32, #tpu.memory_space<vmem>>, vector<8x512xf32>,
    %c71_i32_80 = arith.constant 71 : i32
    %164 = tpu.dynamic_rotate %153 by %c71_i32_80 dim 1 : vector<8x512xf32>, i32 -> vector<8x512xf32>
    %c2_81 = arith.constant 2 : index
    %c0_82 = arith.constant 0 : index
    %165 = vector.load %arg2[%c2_81, %c0_82] : memref<27x512xf32, #tpu.memory_space<vmem>>, vector<1x512xf32>
    %166 = vector.broadcast %165 : vector<1x512xf32> to vector<8x512xf32>
    %167 = arith.mulf %164, %166 : vector<8x512xf32>
    %c16_83 = arith.constant 16 : index
    %c0_84 = arith.constant 0 : index
    %168 = vector.load %arg7[%c16_83, %c0_84] : memref<216x512xf32, #tpu.memory_space<vmem>>, vector<8x512xf32>
    tpu.vector_store %arg7[%c16_83, %c0_84], %167 {strides = array<i32>} : memref<216x512xf32, #tpu.memory_space<vmem>>, vector<8x512xf32>,
    %c65_i32_85 = arith.constant 65 : i32
    %169 = tpu.dynamic_rotate %153 by %c65_i32_85 dim 1 : vector<8x512xf32>, i32 -> vector<8x512xf32>
    %c3_86 = arith.constant 3 : index
    %c0_87 = arith.constant 0 : index
    %170 = vector.load %arg2[%c3_86, %c0_87] : memref<27x512xf32, #tpu.memory_space<vmem>>, vector<1x512xf32>
    %171 = vector.broadcast %170 : vector<1x512xf32> to vector<8x512xf32>
    %172 = arith.mulf %169, %171 : vector<8x512xf32>
    %c24_88 = arith.constant 24 : index
    %c0_89 = arith.constant 0 : index
    %173 = vector.load %arg7[%c24_88, %c0_89] : memref<216x512xf32, #tpu.memory_space<vmem>>, vector<8x512xf32>
    tpu.vector_store %arg7[%c24_88, %c0_89], %172 {strides = array<i32>} : memref<216x512xf32, #tpu.memory_space<vmem>>, vector<8x512xf32>,
    %c64_i32_90 = arith.constant 64 : i32
    %174 = tpu.dynamic_rotate %153 by %c64_i32_90 dim 1 : vector<8x512xf32>, i32 -> vector<8x512xf32>
    %c4_91 = arith.constant 4 : index
    %c0_92 = arith.constant 0 : index
    %175 = vector.load %arg2[%c4_91, %c0_92] : memref<27x512xf32, #tpu.memory_space<vmem>>, vector<1x512xf32>
    %176 = vector.broadcast %175 : vector<1x512xf32> to vector<8x512xf32>
    %177 = arith.mulf %174, %176 : vector<8x512xf32>
    %c32_93 = arith.constant 32 : index
    %c0_94 = arith.constant 0 : index
    %178 = vector.load %arg7[%c32_93, %c0_94] : memref<216x512xf32, #tpu.memory_space<vmem>>, vector<8x512xf32>
    tpu.vector_store %arg7[%c32_93, %c0_94], %177 {strides = array<i32>} : memref<216x512xf32, #tpu.memory_space<vmem>>, vector<8x512xf32>,
    %c63_i32_95 = arith.constant 63 : i32
    %179 = tpu.dynamic_rotate %153 by %c63_i32_95 dim 1 : vector<8x512xf32>, i32 -> vector<8x512xf32>
    %c5_96 = arith.constant 5 : index
    %c0_97 = arith.constant 0 : index
    %180 = vector.load %arg2[%c5_96, %c0_97] : memref<27x512xf32, #tpu.memory_space<vmem>>, vector<1x512xf32>
    %181 = vector.broadcast %180 : vector<1x512xf32> to vector<8x512xf32>
    %182 = arith.mulf %179, %181 : vector<8x512xf32>
    %c40_98 = arith.constant 40 : index
    %c0_99 = arith.constant 0 : index
    %183 = vector.load %arg7[%c40_98, %c0_99] : memref<216x512xf32, #tpu.memory_space<vmem>>, vector<8x512xf32>
    tpu.vector_store %arg7[%c40_98, %c0_99], %182 {strides = array<i32>} : memref<216x512xf32, #tpu.memory_space<vmem>>, vector<8x512xf32>,
    %c57_i32_100 = arith.constant 57 : i32
    %184 = tpu.dynamic_rotate %153 by %c57_i32_100 dim 1 : vector<8x512xf32>, i32 -> vector<8x512xf32>
    %c6_101 = arith.constant 6 : index
    %c0_102 = arith.constant 0 : index
    %185 = vector.load %arg2[%c6_101, %c0_102] : memref<27x512xf32, #tpu.memory_space<vmem>>, vector<1x512xf32>
    %186 = vector.broadcast %185 : vector<1x512xf32> to vector<8x512xf32>
    %187 = arith.mulf %184, %186 : vector<8x512xf32>
    %c48_103 = arith.constant 48 : index
    %c0_104 = arith.constant 0 : index
    %188 = vector.load %arg7[%c48_103, %c0_104] : memref<216x512xf32, #tpu.memory_space<vmem>>, vector<8x512xf32>
    tpu.vector_store %arg7[%c48_103, %c0_104], %187 {strides = array<i32>} : memref<216x512xf32, #tpu.memory_space<vmem>>, vector<8x512xf32>,
    %c56_i32_105 = arith.constant 56 : i32
    %189 = tpu.dynamic_rotate %153 by %c56_i32_105 dim 1 : vector<8x512xf32>, i32 -> vector<8x512xf32>
    %c7_106 = arith.constant 7 : index
    %c0_107 = arith.constant 0 : index
    %190 = vector.load %arg2[%c7_106, %c0_107] : memref<27x512xf32, #tpu.memory_space<vmem>>, vector<1x512xf32>
    %191 = vector.broadcast %190 : vector<1x512xf32> to vector<8x512xf32>
    %192 = arith.mulf %189, %191 : vector<8x512xf32>
    %c56_108 = arith.constant 56 : index
    %c0_109 = arith.constant 0 : index
    %193 = vector.load %arg7[%c56_108, %c0_109] : memref<216x512xf32, #tpu.memory_space<vmem>>, vector<8x512xf32>
    tpu.vector_store %arg7[%c56_108, %c0_109], %192 {strides = array<i32>} : memref<216x512xf32, #tpu.memory_space<vmem>>, vector<8x512xf32>,
    %c55_i32_110 = arith.constant 55 : i32
    %194 = tpu.dynamic_rotate %153 by %c55_i32_110 dim 1 : vector<8x512xf32>, i32 -> vector<8x512xf32>
    %c8_111 = arith.constant 8 : index
    %c0_112 = arith.constant 0 : index
    %195 = vector.load %arg2[%c8_111, %c0_112] : memref<27x512xf32, #tpu.memory_space<vmem>>, vector<1x512xf32>
    %196 = vector.broadcast %195 : vector<1x512xf32> to vector<8x512xf32>
    %197 = arith.mulf %194, %196 : vector<8x512xf32>
    %c64_113 = arith.constant 64 : index
    %c0_114 = arith.constant 0 : index
    %198 = vector.load %arg7[%c64_113, %c0_114] : memref<216x512xf32, #tpu.memory_space<vmem>>, vector<8x512xf32>
    tpu.vector_store %arg7[%c64_113, %c0_114], %197 {strides = array<i32>} : memref<216x512xf32, #tpu.memory_space<vmem>>, vector<8x512xf32>,
    %c9_i32_115 = arith.constant 9 : i32
    %199 = tpu.dynamic_rotate %153 by %c9_i32_115 dim 1 : vector<8x512xf32>, i32 -> vector<8x512xf32>
    %c9_116 = arith.constant 9 : index
    %c0_117 = arith.constant 0 : index
    %200 = vector.load %arg2[%c9_116, %c0_117] : memref<27x512xf32, #tpu.memory_space<vmem>>, vector<1x512xf32>
    %201 = vector.broadcast %200 : vector<1x512xf32> to vector<8x512xf32>
    %202 = arith.mulf %199, %201 : vector<8x512xf32>
    %c72_118 = arith.constant 72 : index
    %c0_119 = arith.constant 0 : index
    %203 = vector.load %arg7[%c72_118, %c0_119] : memref<216x512xf32, #tpu.memory_space<vmem>>, vector<8x512xf32>
    tpu.vector_store %arg7[%c72_118, %c0_119], %202 {strides = array<i32>} : memref<216x512xf32, #tpu.memory_space<vmem>>, vector<8x512xf32>,
    %c8_i32_120 = arith.constant 8 : i32
    %204 = tpu.dynamic_rotate %153 by %c8_i32_120 dim 1 : vector<8x512xf32>, i32 -> vector<8x512xf32>
    %c10_121 = arith.constant 10 : index
    %c0_122 = arith.constant 0 : index
    %205 = vector.load %arg2[%c10_121, %c0_122] : memref<27x512xf32, #tpu.memory_space<vmem>>, vector<1x512xf32>
    %206 = vector.broadcast %205 : vector<1x512xf32> to vector<8x512xf32>
    %207 = arith.mulf %204, %206 : vector<8x512xf32>
    %c80_123 = arith.constant 80 : index
    %c0_124 = arith.constant 0 : index
    %208 = vector.load %arg7[%c80_123, %c0_124] : memref<216x512xf32, #tpu.memory_space<vmem>>, vector<8x512xf32>
    tpu.vector_store %arg7[%c80_123, %c0_124], %207 {strides = array<i32>} : memref<216x512xf32, #tpu.memory_space<vmem>>, vector<8x512xf32>,
    %c7_i32_125 = arith.constant 7 : i32
    %209 = tpu.dynamic_rotate %153 by %c7_i32_125 dim 1 : vector<8x512xf32>, i32 -> vector<8x512xf32>
    %c11_126 = arith.constant 11 : index
    %c0_127 = arith.constant 0 : index
    %210 = vector.load %arg2[%c11_126, %c0_127] : memref<27x512xf32, #tpu.memory_space<vmem>>, vector<1x512xf32>
    %211 = vector.broadcast %210 : vector<1x512xf32> to vector<8x512xf32>
    %212 = arith.mulf %209, %211 : vector<8x512xf32>
    %c88_128 = arith.constant 88 : index
    %c0_129 = arith.constant 0 : index
    %213 = vector.load %arg7[%c88_128, %c0_129] : memref<216x512xf32, #tpu.memory_space<vmem>>, vector<8x512xf32>
    tpu.vector_store %arg7[%c88_128, %c0_129], %212 {strides = array<i32>} : memref<216x512xf32, #tpu.memory_space<vmem>>, vector<8x512xf32>,
    %c1_i32_130 = arith.constant 1 : i32
    %214 = tpu.dynamic_rotate %153 by %c1_i32_130 dim 1 : vector<8x512xf32>, i32 -> vector<8x512xf32>
    %c12_131 = arith.constant 12 : index
    %c0_132 = arith.constant 0 : index
    %215 = vector.load %arg2[%c12_131, %c0_132] : memref<27x512xf32, #tpu.memory_space<vmem>>, vector<1x512xf32>
    %216 = vector.broadcast %215 : vector<1x512xf32> to vector<8x512xf32>
    %217 = arith.mulf %214, %216 : vector<8x512xf32>
    %c96_133 = arith.constant 96 : index
    %c0_134 = arith.constant 0 : index
    %218 = vector.load %arg7[%c96_133, %c0_134] : memref<216x512xf32, #tpu.memory_space<vmem>>, vector<8x512xf32>
    tpu.vector_store %arg7[%c96_133, %c0_134], %217 {strides = array<i32>} : memref<216x512xf32, #tpu.memory_space<vmem>>, vector<8x512xf32>,
    %c104_135 = arith.constant 104 : index
    %c0_136 = arith.constant 0 : index
    %219 = vector.load %arg7[%c104_135, %c0_136] : memref<216x512xf32, #tpu.memory_space<vmem>>, vector<8x512xf32>
    tpu.vector_store %arg7[%c104_135, %c0_136], %153 {strides = array<i32>} : memref<216x512xf32, #tpu.memory_space<vmem>>, vector<8x512xf32>,
    %c511_i32_137 = arith.constant 511 : i32
    %220 = tpu.dynamic_rotate %153 by %c511_i32_137 dim 1 : vector<8x512xf32>, i32 -> vector<8x512xf32>
    %c14_138 = arith.constant 14 : index
    %c0_139 = arith.constant 0 : index
    %221 = vector.load %arg2[%c14_138, %c0_139] : memref<27x512xf32, #tpu.memory_space<vmem>>, vector<1x512xf32>
    %222 = vector.broadcast %221 : vector<1x512xf32> to vector<8x512xf32>
    %223 = arith.mulf %220, %222 : vector<8x512xf32>
    %c112_140 = arith.constant 112 : index
    %c0_141 = arith.constant 0 : index
    %224 = vector.load %arg7[%c112_140, %c0_141] : memref<216x512xf32, #tpu.memory_space<vmem>>, vector<8x512xf32>
    tpu.vector_store %arg7[%c112_140, %c0_141], %223 {strides = array<i32>} : memref<216x512xf32, #tpu.memory_space<vmem>>, vector<8x512xf32>,
    %c505_i32_142 = arith.constant 505 : i32
    %225 = tpu.dynamic_rotate %153 by %c505_i32_142 dim 1 : vector<8x512xf32>, i32 -> vector<8x512xf32>
    %c15_143 = arith.constant 15 : index
    %c0_144 = arith.constant 0 : index
    %226 = vector.load %arg2[%c15_143, %c0_144] : memref<27x512xf32, #tpu.memory_space<vmem>>, vector<1x512xf32>
    %227 = vector.broadcast %226 : vector<1x512xf32> to vector<8x512xf32>
    %228 = arith.mulf %225, %227 : vector<8x512xf32>
    %c120_145 = arith.constant 120 : index
    %c0_146 = arith.constant 0 : index
    %229 = vector.load %arg7[%c120_145, %c0_146] : memref<216x512xf32, #tpu.memory_space<vmem>>, vector<8x512xf32>
    tpu.vector_store %arg7[%c120_145, %c0_146], %228 {strides = array<i32>} : memref<216x512xf32, #tpu.memory_space<vmem>>, vector<8x512xf32>,
    %c504_i32_147 = arith.constant 504 : i32
    %230 = tpu.dynamic_rotate %153 by %c504_i32_147 dim 1 : vector<8x512xf32>, i32 -> vector<8x512xf32>
    %c16_148 = arith.constant 16 : index
    %c0_149 = arith.constant 0 : index
    %231 = vector.load %arg2[%c16_148, %c0_149] : memref<27x512xf32, #tpu.memory_space<vmem>>, vector<1x512xf32>
    %232 = vector.broadcast %231 : vector<1x512xf32> to vector<8x512xf32>
    %233 = arith.mulf %230, %232 : vector<8x512xf32>
    %c128_150 = arith.constant 128 : index
    %c0_151 = arith.constant 0 : index
    %234 = vector.load %arg7[%c128_150, %c0_151] : memref<216x512xf32, #tpu.memory_space<vmem>>, vector<8x512xf32>
    tpu.vector_store %arg7[%c128_150, %c0_151], %233 {strides = array<i32>} : memref<216x512xf32, #tpu.memory_space<vmem>>, vector<8x512xf32>,
    %c503_i32_152 = arith.constant 503 : i32
    %235 = tpu.dynamic_rotate %153 by %c503_i32_152 dim 1 : vector<8x512xf32>, i32 -> vector<8x512xf32>
    %c17_153 = arith.constant 17 : index
    %c0_154 = arith.constant 0 : index
    %236 = vector.load %arg2[%c17_153, %c0_154] : memref<27x512xf32, #tpu.memory_space<vmem>>, vector<1x512xf32>
    %237 = vector.broadcast %236 : vector<1x512xf32> to vector<8x512xf32>
    %238 = arith.mulf %235, %237 : vector<8x512xf32>
    %c136_155 = arith.constant 136 : index
    %c0_156 = arith.constant 0 : index
    %239 = vector.load %arg7[%c136_155, %c0_156] : memref<216x512xf32, #tpu.memory_space<vmem>>, vector<8x512xf32>
    tpu.vector_store %arg7[%c136_155, %c0_156], %238 {strides = array<i32>} : memref<216x512xf32, #tpu.memory_space<vmem>>, vector<8x512xf32>,
    %c457_i32_157 = arith.constant 457 : i32
    %240 = tpu.dynamic_rotate %153 by %c457_i32_157 dim 1 : vector<8x512xf32>, i32 -> vector<8x512xf32>
    %c18_158 = arith.constant 18 : index
    %c0_159 = arith.constant 0 : index
    %241 = vector.load %arg2[%c18_158, %c0_159] : memref<27x512xf32, #tpu.memory_space<vmem>>, vector<1x512xf32>
    %242 = vector.broadcast %241 : vector<1x512xf32> to vector<8x512xf32>
    %243 = arith.mulf %240, %242 : vector<8x512xf32>
    %c144_160 = arith.constant 144 : index
    %c0_161 = arith.constant 0 : index
    %244 = vector.load %arg7[%c144_160, %c0_161] : memref<216x512xf32, #tpu.memory_space<vmem>>, vector<8x512xf32>
    tpu.vector_store %arg7[%c144_160, %c0_161], %243 {strides = array<i32>} : memref<216x512xf32, #tpu.memory_space<vmem>>, vector<8x512xf32>,
    %c456_i32_162 = arith.constant 456 : i32
    %245 = tpu.dynamic_rotate %153 by %c456_i32_162 dim 1 : vector<8x512xf32>, i32 -> vector<8x512xf32>
    %c19_163 = arith.constant 19 : index
    %c0_164 = arith.constant 0 : index
    %246 = vector.load %arg2[%c19_163, %c0_164] : memref<27x512xf32, #tpu.memory_space<vmem>>, vector<1x512xf32>
    %247 = vector.broadcast %246 : vector<1x512xf32> to vector<8x512xf32>
    %248 = arith.mulf %245, %247 : vector<8x512xf32>
    %c152_165 = arith.constant 152 : index
    %c0_166 = arith.constant 0 : index
    %249 = vector.load %arg7[%c152_165, %c0_166] : memref<216x512xf32, #tpu.memory_space<vmem>>, vector<8x512xf32>
    tpu.vector_store %arg7[%c152_165, %c0_166], %248 {strides = array<i32>} : memref<216x512xf32, #tpu.memory_space<vmem>>, vector<8x512xf32>,
    %c455_i32_167 = arith.constant 455 : i32
    %250 = tpu.dynamic_rotate %153 by %c455_i32_167 dim 1 : vector<8x512xf32>, i32 -> vector<8x512xf32>
    %c20_168 = arith.constant 20 : index
    %c0_169 = arith.constant 0 : index
    %251 = vector.load %arg2[%c20_168, %c0_169] : memref<27x512xf32, #tpu.memory_space<vmem>>, vector<1x512xf32>
    %252 = vector.broadcast %251 : vector<1x512xf32> to vector<8x512xf32>
    %253 = arith.mulf %250, %252 : vector<8x512xf32>
    %c160_170 = arith.constant 160 : index
    %c0_171 = arith.constant 0 : index
    %254 = vector.load %arg7[%c160_170, %c0_171] : memref<216x512xf32, #tpu.memory_space<vmem>>, vector<8x512xf32>
    tpu.vector_store %arg7[%c160_170, %c0_171], %253 {strides = array<i32>} : memref<216x512xf32, #tpu.memory_space<vmem>>, vector<8x512xf32>,
    %c449_i32_172 = arith.constant 449 : i32
    %255 = tpu.dynamic_rotate %153 by %c449_i32_172 dim 1 : vector<8x512xf32>, i32 -> vector<8x512xf32>
    %c21_173 = arith.constant 21 : index
    %c0_174 = arith.constant 0 : index
    %256 = vector.load %arg2[%c21_173, %c0_174] : memref<27x512xf32, #tpu.memory_space<vmem>>, vector<1x512xf32>
    %257 = vector.broadcast %256 : vector<1x512xf32> to vector<8x512xf32>
    %258 = arith.mulf %255, %257 : vector<8x512xf32>
    %c168_175 = arith.constant 168 : index
    %c0_176 = arith.constant 0 : index
    %259 = vector.load %arg7[%c168_175, %c0_176] : memref<216x512xf32, #tpu.memory_space<vmem>>, vector<8x512xf32>
    tpu.vector_store %arg7[%c168_175, %c0_176], %258 {strides = array<i32>} : memref<216x512xf32, #tpu.memory_space<vmem>>, vector<8x512xf32>,
    %c448_i32_177 = arith.constant 448 : i32
    %260 = tpu.dynamic_rotate %153 by %c448_i32_177 dim 1 : vector<8x512xf32>, i32 -> vector<8x512xf32>
    %c22_178 = arith.constant 22 : index
    %c0_179 = arith.constant 0 : index
    %261 = vector.load %arg2[%c22_178, %c0_179] : memref<27x512xf32, #tpu.memory_space<vmem>>, vector<1x512xf32>
    %262 = vector.broadcast %261 : vector<1x512xf32> to vector<8x512xf32>
    %263 = arith.mulf %260, %262 : vector<8x512xf32>
    %c176_180 = arith.constant 176 : index
    %c0_181 = arith.constant 0 : index
    %264 = vector.load %arg7[%c176_180, %c0_181] : memref<216x512xf32, #tpu.memory_space<vmem>>, vector<8x512xf32>
    tpu.vector_store %arg7[%c176_180, %c0_181], %263 {strides = array<i32>} : memref<216x512xf32, #tpu.memory_space<vmem>>, vector<8x512xf32>,
    %c447_i32_182 = arith.constant 447 : i32
    %265 = tpu.dynamic_rotate %153 by %c447_i32_182 dim 1 : vector<8x512xf32>, i32 -> vector<8x512xf32>
    %c23_183 = arith.constant 23 : index
    %c0_184 = arith.constant 0 : index
    %266 = vector.load %arg2[%c23_183, %c0_184] : memref<27x512xf32, #tpu.memory_space<vmem>>, vector<1x512xf32>
    %267 = vector.broadcast %266 : vector<1x512xf32> to vector<8x512xf32>
    %268 = arith.mulf %265, %267 : vector<8x512xf32>
    %c184_185 = arith.constant 184 : index
    %c0_186 = arith.constant 0 : index
    %269 = vector.load %arg7[%c184_185, %c0_186] : memref<216x512xf32, #tpu.memory_space<vmem>>, vector<8x512xf32>
    tpu.vector_store %arg7[%c184_185, %c0_186], %268 {strides = array<i32>} : memref<216x512xf32, #tpu.memory_space<vmem>>, vector<8x512xf32>,
    %c441_i32_187 = arith.constant 441 : i32
    %270 = tpu.dynamic_rotate %153 by %c441_i32_187 dim 1 : vector<8x512xf32>, i32 -> vector<8x512xf32>
    %c24_188 = arith.constant 24 : index
    %c0_189 = arith.constant 0 : index
    %271 = vector.load %arg2[%c24_188, %c0_189] : memref<27x512xf32, #tpu.memory_space<vmem>>, vector<1x512xf32>
    %272 = vector.broadcast %271 : vector<1x512xf32> to vector<8x512xf32>
    %273 = arith.mulf %270, %272 : vector<8x512xf32>
    %c192_190 = arith.constant 192 : index
    %c0_191 = arith.constant 0 : index
    %274 = vector.load %arg7[%c192_190, %c0_191] : memref<216x512xf32, #tpu.memory_space<vmem>>, vector<8x512xf32>
    tpu.vector_store %arg7[%c192_190, %c0_191], %273 {strides = array<i32>} : memref<216x512xf32, #tpu.memory_space<vmem>>, vector<8x512xf32>,
    %c440_i32_192 = arith.constant 440 : i32
    %275 = tpu.dynamic_rotate %153 by %c440_i32_192 dim 1 : vector<8x512xf32>, i32 -> vector<8x512xf32>
    %c25_193 = arith.constant 25 : index
    %c0_194 = arith.constant 0 : index
    %276 = vector.load %arg2[%c25_193, %c0_194] : memref<27x512xf32, #tpu.memory_space<vmem>>, vector<1x512xf32>
    %277 = vector.broadcast %276 : vector<1x512xf32> to vector<8x512xf32>
    %278 = arith.mulf %275, %277 : vector<8x512xf32>
    %c200_195 = arith.constant 200 : index
    %c0_196 = arith.constant 0 : index
    %279 = vector.load %arg7[%c200_195, %c0_196] : memref<216x512xf32, #tpu.memory_space<vmem>>, vector<8x512xf32>
    tpu.vector_store %arg7[%c200_195, %c0_196], %278 {strides = array<i32>} : memref<216x512xf32, #tpu.memory_space<vmem>>, vector<8x512xf32>,
    %c439_i32_197 = arith.constant 439 : i32
    %280 = tpu.dynamic_rotate %153 by %c439_i32_197 dim 1 : vector<8x512xf32>, i32 -> vector<8x512xf32>
    %c26_198 = arith.constant 26 : index
    %c0_199 = arith.constant 0 : index
    %281 = vector.load %arg2[%c26_198, %c0_199] : memref<27x512xf32, #tpu.memory_space<vmem>>, vector<1x512xf32>
    %282 = vector.broadcast %281 : vector<1x512xf32> to vector<8x512xf32>
    %283 = arith.mulf %280, %282 : vector<8x512xf32>
    %c208_200 = arith.constant 208 : index
    %c0_201 = arith.constant 0 : index
    %284 = vector.load %arg7[%c208_200, %c0_201] : memref<216x512xf32, #tpu.memory_space<vmem>>, vector<8x512xf32>
    tpu.vector_store %arg7[%c208_200, %c0_201], %283 {strides = array<i32>} : memref<216x512xf32, #tpu.memory_space<vmem>>, vector<8x512xf32>,
    %c0_202 = arith.constant 0 : index
    %c0_203 = arith.constant 0 : index
    %285 = vector.load %arg4[%c0_202, %c0_203] : memref<8x216xf32, #tpu.memory_space<vmem>>, vector<8x216xf32>
    %c0_204 = arith.constant 0 : index
    %c0_205 = arith.constant 0 : index
    %286 = vector.load %arg7[%c0_204, %c0_205] : memref<216x512xf32, #tpu.memory_space<vmem>>, vector<216x512xf32>
    %cst_206 = arith.constant dense<0.000000e+00> : vector<8x512xf32>
    %287 = tpu.matmul %285, %286, %cst_206 {dimension_numbers = #tpu.dot_dimension_numbers<[1], [0], [0], [1], [0, 0, 1, 1], [], []>} : vector<8x216xf32>, vector<216x512xf32>, vector<8x512xf32> -> vector<8x512xf32>
    %cst_207 = arith.constant dense<0.000000e+00> : vector<8xf32>
    %288 = vector.multi_reduction <add>, %287, %cst_207 [1] : vector<8x512xf32> to vector<8xf32>
    %289 = vector.shape_cast %288 : vector<8xf32> to vector<8x1xf32>
    %cst_208 = arith.constant 5.120000e+02 : f32
    %290 = vector.broadcast %cst_208 : f32 to vector<8x1xf32>
    %291 = arith.divf %289, %290 : vector<8x1xf32>
    %292 = vector.broadcast %291 : vector<8x1xf32> to vector<8x512xf32>
    %293 = arith.subf %287, %292 : vector<8x512xf32>
    %294 = arith.mulf %293, %293 : vector<8x512xf32>
    %cst_209 = arith.constant dense<0.000000e+00> : vector<8xf32>
    %295 = vector.multi_reduction <add>, %294, %cst_209 [1] : vector<8x512xf32> to vector<8xf32>
    %296 = vector.shape_cast %295 : vector<8xf32> to vector<8x1xf32>
    %cst_210 = arith.constant 5.120000e+02 : f32
    %297 = vector.broadcast %cst_210 : f32 to vector<8x1xf32>
    %298 = arith.divf %296, %297 : vector<8x1xf32>
    %cst_211 = arith.constant 9.99999974E-6 : f32
    %299 = vector.broadcast %cst_211 : f32 to vector<8x1xf32>
    %300 = arith.addf %298, %299 : vector<8x1xf32>
    %301 = math.rsqrt %300 : vector<8x1xf32>
    %302 = vector.broadcast %301 : vector<8x1xf32> to vector<8x512xf32>
    %303 = arith.mulf %293, %302 : vector<8x512xf32>
    %cst_212 = arith.constant 0.000000e+00 : f32
    %304 = vector.broadcast %cst_212 : f32 to vector<8x512xf32>
    %305 = arith.maximumf %303, %304 : vector<8x512xf32>
    %c0_213 = arith.constant 0 : index
    %c0_214 = arith.constant 0 : index
    %c0_215 = arith.constant 0 : index
    %306 = vector.load %arg6[%c0_213, %c0_214, %c0_215] : memref<1x8x512xf32, #tpu.memory_space<vmem>>, vector<1x8x512xf32>
    %307 = vector.shape_cast %306 : vector<1x8x512xf32> to vector<8x512xf32>
    %308 = vector.shape_cast %305 : vector<8x512xf32> to vector<1x8x512xf32>
    tpu.vector_store %arg6[%c0_213, %c0_214, %c0_215], %308 {strides = array<i32>} : memref<1x8x512xf32, #tpu.memory_space<vmem>>, vector<1x8x512xf32>,
    %309 = arith.addf %1, %305 : vector<8x512xf32>
    %c0_216 = arith.constant 0 : index
    %c0_217 = arith.constant 0 : index
    %c0_218 = arith.constant 0 : index
    %310 = vector.load %arg5[%c0_216, %c0_217, %c0_218] : memref<1x8x512xf32, #tpu.memory_space<vmem>>, vector<1x8x512xf32>
    %311 = vector.shape_cast %310 : vector<1x8x512xf32> to vector<8x512xf32>
    %312 = vector.shape_cast %309 : vector<8x512xf32> to vector<1x8x512xf32>
    tpu.vector_store %arg5[%c0_216, %c0_217, %c0_218], %312 {strides = array<i32>} : memref<1x8x512xf32, #tpu.memory_space<vmem>>, vector<1x8x512xf32>,
    return
  }
  func.func @transform_0(%arg0: i32) -> (i32, i32, i32) {
    %c0_i32 = arith.constant 0 : i32
    %c0_i32_0 = arith.constant 0 : i32
    %c0_i32_1 = arith.constant 0 : i32
    return %arg0, %c0_i32, %c0_i32_0 : i32, i32, i32
  }
  func.func @transform_1(%arg0: i32) -> (i32, i32) {
    %c0_i32 = arith.constant 0 : i32
    %c0_i32_0 = arith.constant 0 : i32
    %c0_i32_1 = arith.constant 0 : i32
    return %c0_i32, %c0_i32_0 : i32, i32
  }
  func.func @transform_2(%arg0: i32) -> (i32, i32) {
    %c0_i32 = arith.constant 0 : i32
    %c0_i32_0 = arith.constant 0 : i32
    %c0_i32_1 = arith.constant 0 : i32
    return %c0_i32, %c0_i32_0 : i32, i32
  }
  func.func @transform_3(%arg0: i32) -> (i32, i32) {
    %c0_i32 = arith.constant 0 : i32
    %c0_i32_0 = arith.constant 0 : i32
    %c0_i32_1 = arith.constant 0 : i32
    return %c0_i32, %c0_i32_0 : i32, i32
  }
  func.func @transform_4(%arg0: i32) -> (i32, i32, i32) {
    %c0_i32 = arith.constant 0 : i32
    %c0_i32_0 = arith.constant 0 : i32
    %c0_i32_1 = arith.constant 0 : i32
    return %arg0, %c0_i32, %c0_i32_0 : i32, i32, i32
  }
  func.func @transform_5(%arg0: i32) -> (i32, i32, i32) {
    %c0_i32 = arith.constant 0 : i32
    %c0_i32_0 = arith.constant 0 : i32
    %c0_i32_1 = arith.constant 0 : i32
    return %arg0, %c0_i32, %c0_i32_0 : i32, i32, i32
  }
}

</mosaic_0001>

<bundles_post_ra>
// kernel: _lambda_.1
= control target key start
LH: loop header
LB: loop body
LE: loop exit
PB: predicated region body
PF: predicated region fallthrough
CT: control target
= control target key end

     0   :  { %s3092_s18 = smov 0   ;;  %s4880_s0 = inlined_call_operand.vmem [shape: f32[2,8,512], index: 0, kind: input, shape index: {}]   ;;  %s4881_s1 = inlined_call_operand.vmem [shape: f32[27,512], index: 1, kind: input, shape index: {}]   ;;  %s4882_s2 = inlined_call_operand.vmem [shape: f32[8,216], index: 2, kind: input, shape index: {}]   ;;  %s4883_s3 = inlined_call_operand.vmem [shape: f32[8,216], index: 3, kind: input, shape index: {}]   ;;  %s4884_s4 = inlined_call_operand.vmem [shape: f32[2,8,512], index: 4, kind: output, shape index: {0}]   ;;  %s4885_s5 = inlined_call_operand.vmem [shape: f32[2,8,512], index: 5, kind: output, shape index: {1}]  }
   0x1 LB: > { %s2934_s19 = sadd.s32 4294967295, %s3043_s18   ;;  %p2938_p0 = scmp.ge.s32.totalorder %s3043_s18, 1  ;;  %s3043_s18 = sphi %s3092_s18, %s16_s18  }
   0x2   : > { %p190_p1 = scmp.lt.s32.totalorder %s3043_s18, 3 }
   0x4   : > { %p191_p2 = pnand %p2938_p0, %p190_p1 }
   0x6   : > { %194 = sbr.rel (%p191_p2) target bundleno = 1565 (0x61d), region = 36 }
   0xb   : > { %p223_p3 = scmp.lt.s32.totalorder %s2934_s19, 1  ;;  %s3045_s24 = smov 121   ;;  %v250_v4 = vlaneseq  ;;  %v2958_v11 = vld [vmem:[%s4881_s1 + $0x27] ss:$8 sm:$0xf]  ;;  %vm1384_vm2 = vcmask 719872  }
   0xc   : > { %s3046_s25 = smov 127   ;;  %s3047_s26 = smov 1   ;;  %v2957_v14 = vld [vmem:[%s4881_s1 + $0x26] ss:$8 sm:$0xf] }
   0xd   : > { %s4952_s19 = smov (!%p223_p3, %s2934_s19), 1  ;;  %s3048_s27 = smov 7   ;;  %v260_v5 = vshrl.u32 %v250_v4, 7  ;;  %v3232_v6 = vand.u32 127, %v250_v4  ;;  %v1275_v37 = vld [vmem:[%s4882_s2 + $0x8] sm:$0xff] }
   0xe   : > { %s3100_s20 = sshll.u32 %s4952_s19, 5  ;;  %s3049_s28 = smov 8   ;;  %v3278_v30 = vld [vmem:[%s4881_s1 + $0x24] ss:$8 sm:$0xf]  ;;  %2970 = vmatprep.mubr.msk.f32.mxu0 %vm1384_vm2, %v1275_v37  ;;  %2971 = vmatprep.mubr.msk.f32.mxu1 %vm1384_vm2, %v1275_v37 }
   0xf   : > { %s3106_s23 = scalar_lea.vmem %s4880_s0, %s3100_s20  ;;  %s3050_s29 = smov 9   ;;  %v3238_v7 = vsub.s32 1, %v260_v5  ;;  %v3240_v8 = vsub.s32 0, %v260_v5  ;;  %vm871_vm0 = vcmp.lt.s32.totalorder %v3232_v6, 121  ;;  %v3257_v18 = vsub.s32 2, %v260_v5 }
  0x10   : > { %v3109_v0 = vld [vmem:[%s3106_s23 + $0x8] sm:$0xff]  ;;  %v3112_v1 = vld [vmem:[%s3106_s23] sm:$0xff]  ;;  %v3119_v2 = vld [vmem:[%s3106_s23 + $0x10] sm:$0xff]  ;;  %s3051_s30 = smov 55   ;;  %s3052_s6 = smov 56   ;;  %v3259_v19 = vsub.s32 3, %v260_v5 }
  0x11   : > { %865 = vrot.lane.b32.xlu0 %v3109_v0, %s3045_s24  ;;  %863 = vrot.lane.b32.xlu1 %v3112_v1, %s3045_s24  ;;  %v3130_v3 = vld [vmem:[%s3106_s23 + $0x18] sm:$0xff]  ;;  %s3053_s7 = smov 57   ;;  %s3054_s8 = smov 63   ;;  %v886_v12 = vrot.slane %v2958_v11, %v3238_v7  ;;  %v882_v13 = vrot.slane %v2958_v11, %v3240_v8  ;;  %vm827_vm1 = vcmp.lt.s32.totalorder %v3232_v6, 127  ;;  %v842_v22 = vrot.slane %v2957_v14, %v3238_v7 }
  0x12   : > { %s3055_s9 = smov 64   ;;  %s3056_s10 = smov 65   ;;  %v838_v23 = vrot.slane %v2957_v14, %v3240_v8  ;;  %v894_v29 = vrot.slane %v2958_v11, %v3259_v19  ;;  %v890_v33 = vrot.slane %v2958_v11, %v3257_v18  ;;  %v794_v36 = vrot.slane %v3278_v30, %v3238_v7  ;;  %v3320_v53 = vld [vmem:[%s4881_s1 + $0x23] ss:$8 sm:$0xf] }
  0x13   : > { %s3057_s11 = smov 71   ;;  %s3058_s12 = smov 72   ;;  %v850_v40 = vrot.slane %v2957_v14, %v3259_v19  ;;  %vm779_vm3 = vcmp.lt.s32.totalorder %v3232_v6, 1  ;;  %v846_v43 = vrot.slane %v2957_v14, %v3257_v18  ;;  %v790_v49 = vrot.slane %v3278_v30, %v3240_v8  ;;  %v3333_v60 = vld [vmem:[%s4881_s1 + $0x22] ss:$8 sm:$0xf] }
  0x14   : > { %s3059_s13 = smov 73   ;;  %s3060_s19 = smov 119   ;;  %vm735_vm4 = vcmp.lt.s32.totalorder %v3232_v6, 7  ;;  %v750_v58 = vrot.slane %v3320_v53, %v3238_v7  ;;  %v746_v59 = vrot.slane %v3320_v53, %v3240_v8  ;;  %vm691_vm5 = vcmp.lt.s32.totalorder %v3232_v6, 8 }
  0x15   : > { %867 = vrot.lane.b32.xlu0 %v3119_v2, %s3045_s24  ;;  %821 = vrot.lane.b32.xlu1 %v3109_v0, %s3046_s25  ;;  %s3061_s14 = smov 120   ;;  %v706_v4 = vrot.slane %v3333_v60, %v3238_v7  ;;  %v702_v11 = vrot.slane %v3333_v60, %v3240_v8  ;;  %v3354_v14 = vld [vmem:[%s4881_s1 + $0x21] ss:$8 sm:$0xf]  ;;  %vm647_vm6 = vcmp.lt.s32.totalorder %v3232_v6, 9  ;;  %vm603_vm7 = vcmp.lt.s32.totalorder %v3232_v6, 55  ;;  %s232_s15 = scalar_lea.vmem %s4884_s4, %s3100_s20 }
  0x16   : > { %vm559_vm8 = vcmp.lt.s32.totalorder %v3232_v6, 56  ;;  %vm515_vm9 = vcmp.lt.s32.totalorder %v3232_v6, 57  ;;  %vm471_vm10 = vcmp.lt.s32.totalorder %v3232_v6, 63  ;;  %vm427_vm11 = vcmp.lt.s32.totalorder %v3232_v6, 64 }
  0x17   : > { %vm383_vm12 = vcmp.lt.s32.totalorder %v3232_v6, 65  ;;  %vm339_vm13 = vcmp.lt.s32.totalorder %v3232_v6, 71  ;;  %vm4890_vm14 = vcmp.lt.s32.totalorder %v3232_v6, 72  ;;  %vm4889_vm15 = vcmp.lt.s32.totalorder %v3232_v6, 73 }
  0x19   : > { %823 = vrot.lane.b32.xlu0 %v3119_v2, %s3046_s25  ;;  %819 = vrot.lane.b32.xlu1 %v3112_v1, %s3046_s25 }
  0x1d   : > { %869 = vrot.lane.b32.xlu0 %v3130_v3, %s3045_s24  ;;  %771 = vrot.lane.b32.xlu1 %v3112_v1, %s3047_s26 }
  0x21   : > { %773 = vrot.lane.b32.xlu0 %v3109_v0, %s3047_s26  ;;  %825 = vrot.lane.b32.xlu1 %v3130_v3, %s3046_s25 }
  0x25   : > { %777 = vrot.lane.b32.xlu0 %v3130_v3, %s3047_s26  ;;  %727 = vrot.lane.b32.xlu1 %v3112_v1, %s3048_s27 }
  0x29   : > { %729 = vrot.lane.b32.xlu0 %v3109_v0, %s3048_s27  ;;  %733 = vrot.lane.b32.xlu1 %v3130_v3, %s3048_s27 }
  0x2d   : > { %683 = vrot.lane.b32.xlu0 %v3112_v1, %s3049_s28  ;;  %685 = vrot.lane.b32.xlu1 %v3109_v0, %s3049_s28 }
  0x31   : > { %775 = vrot.lane.b32.xlu0 %v3119_v2, %s3047_s26  ;;  %689 = vrot.lane.b32.xlu1 %v3130_v3, %s3049_s28 }
  0x35   : > { %639 = vrot.lane.b32.xlu0 %v3112_v1, %s3050_s29  ;;  %641 = vrot.lane.b32.xlu1 %v3109_v0, %s3050_s29 }
  0x39   : > { %731 = vrot.lane.b32.xlu0 %v3119_v2, %s3048_s27  ;;  %645 = vrot.lane.b32.xlu1 %v3130_v3, %s3050_s29 }
  0x3d   : > { %595 = vrot.lane.b32.xlu0 %v3112_v1, %s3051_s30  ;;  %597 = vrot.lane.b32.xlu1 %v3109_v0, %s3051_s30 }
  0x41   : > { %687 = vrot.lane.b32.xlu0 %v3119_v2, %s3049_s28  ;;  %601 = vrot.lane.b32.xlu1 %v3130_v3, %s3051_s30 }
  0x45   : > { %551 = vrot.lane.b32.xlu0 %v3112_v1, %s3052_s6  ;;  %553 = vrot.lane.b32.xlu1 %v3109_v0, %s3052_s6 }
  0x49   : > { %643 = vrot.lane.b32.xlu0 %v3119_v2, %s3050_s29  ;;  %557 = vrot.lane.b32.xlu1 %v3130_v3, %s3052_s6 }
  0x4d   : > { %507 = vrot.lane.b32.xlu0 %v3112_v1, %s3053_s7  ;;  %509 = vrot.lane.b32.xlu1 %v3109_v0, %s3053_s7 }
  0x51   : > { %599 = vrot.lane.b32.xlu0 %v3119_v2, %s3051_s30  ;;  %513 = vrot.lane.b32.xlu1 %v3130_v3, %s3053_s7 }
  0x55   : > { %463 = vrot.lane.b32.xlu0 %v3112_v1, %s3054_s8  ;;  %465 = vrot.lane.b32.xlu1 %v3109_v0, %s3054_s8 }
  0x59   : > { %555 = vrot.lane.b32.xlu0 %v3119_v2, %s3052_s6  ;;  %469 = vrot.lane.b32.xlu1 %v3130_v3, %s3054_s8 }
  0x5d   : > { %419 = vrot.lane.b32.xlu0 %v3112_v1, %s3055_s9  ;;  %421 = vrot.lane.b32.xlu1 %v3109_v0, %s3055_s9 }
  0x61   : > { %511 = vrot.lane.b32.xlu0 %v3119_v2, %s3053_s7  ;;  %425 = vrot.lane.b32.xlu1 %v3130_v3, %s3055_s9 }
  0x65   : > { %375 = vrot.lane.b32.xlu0 %v3112_v1, %s3056_s10  ;;  %377 = vrot.lane.b32.xlu1 %v3109_v0, %s3056_s10 }
  0x69   : > { %467 = vrot.lane.b32.xlu0 %v3119_v2, %s3054_s8  ;;  %381 = vrot.lane.b32.xlu1 %v3130_v3, %s3056_s10 }
  0x6d   : > { %331 = vrot.lane.b32.xlu0 %v3112_v1, %s3057_s11  ;;  %333 = vrot.lane.b32.xlu1 %v3109_v0, %s3057_s11 }
  0x71   : > { %423 = vrot.lane.b32.xlu0 %v3119_v2, %s3055_s9  ;;  %337 = vrot.lane.b32.xlu1 %v3130_v3, %s3057_s11 }
  0x75   : > { %287 = vrot.lane.b32.xlu0 %v3112_v1, %s3058_s12  ;;  %289 = vrot.lane.b32.xlu1 %v3109_v0, %s3058_s12 }
  0x79   : > { %379 = vrot.lane.b32.xlu0 %v3119_v2, %s3056_s10  ;;  %293 = vrot.lane.b32.xlu1 %v3130_v3, %s3058_s12 }
  0x7d   : > { %242 = vrot.lane.b32.xlu0 %v3112_v1, %s3059_s13  ;;  %244 = vrot.lane.b32.xlu1 %v3109_v0, %s3059_s13 }
  0x81   : > { %335 = vrot.lane.b32.xlu0 %v3119_v2, %s3057_s11  ;;  %248 = vrot.lane.b32.xlu1 %v3130_v3, %s3059_s13 }
  0x83   : > { %v866_v9 = vpop.permute.xlu0 %865  ;;  %v864_v10 = vpop.permute.xlu1 %863 }
  0x84   : > { %v874_v17 = vsel %vm871_vm0, %v864_v10, %v866_v9 }
  0x85   : > { %291 = vrot.lane.b32.xlu0 %v3119_v2, %s3058_s12  ;;  %246 = vrot.lane.b32.xlu1 %v3119_v2, %s3059_s13  ;;  %v899_v24 = vmul.f32 %v882_v13, %v874_v17  ;;  %v798_v13 = vrot.slane %v3278_v30, %v3257_v18 }
  0x87   : > { %v868_v15 = vpop.permute.xlu0 %867  ;;  %v822_v16 = vpop.permute.xlu1 %821 }
  0x88   : > { %v873_v20 = vsel %vm871_vm0, %v866_v9, %v868_v15 }
  0x89   : > { %953 = vrot.lane.b32.xlu0 %v3109_v0, %s3060_s19  ;;  %v900_v21 = vmul.f32 %v886_v12, %v873_v20  ;;  %955 = vrot.lane.b32.xlu1 %v3119_v2, %s3060_s19  ;;  %v802_v12 = vrot.slane %v3278_v30, %v3259_v19  ;;  %v658_v30 = vrot.slane %v3354_v14, %v3240_v8 }
  0x8b   : > { %1388 = vmatprep.subr.mxu0 %v900_v21  ;;  %v824_v25 = vpop.permute.xlu0 %823  ;;  %v820_v26 = vpop.permute.xlu1 %819 }
  0x8c   : > { %v829_v27 = vsel %vm827_vm1, %v822_v16, %v824_v25  ;;  %v830_v28 = vsel %vm827_vm1, %v820_v26, %v822_v16  ;;  %1389 = vmatpush1.msra.mxu0 %v899_v24 }
  0x8d   : > { %951 = vrot.lane.b32.xlu0 %v3112_v1, %s3060_s19  ;;  %909 = vrot.lane.b32.xlu1 %v3109_v0, %s3061_s14  ;;  %v856_v31 = vmul.f32 %v842_v22, %v829_v27  ;;  %v855_v32 = vmul.f32 %v838_v23, %v830_v28 }
  0x8f   : > { %v870_v34 = vpop.permute.xlu0 %869  ;;  %1390 = vmatprep.subr.mxu0 %v856_v31  ;;  %v772_v35 = vpop.permute.xlu1 %771  ;;  %v758_v31 = vrot.slane %v3320_v53, %v3259_v19 }
  0x90   : > { %1391 = vmatpush1.msra.mxu0 %v855_v32  ;;  %v875_v38 = vsel %vm871_vm0, %v870_v34, %v864_v10  ;;  %v872_v39 = vsel %vm871_vm0, %v868_v15, %v870_v34  ;;  %v754_v32 = vrot.slane %v3320_v53, %v3257_v18 }
  0x91   : > { %911 = vrot.lane.b32.xlu0 %v3119_v2, %s3061_s14  ;;  %907 = vrot.lane.b32.xlu1 %v3112_v1, %s3061_s14  ;;  %v902_v41 = vmul.f32 %v894_v29, %v875_v38  ;;  %v901_v42 = vmul.f32 %v890_v33, %v872_v39  ;;  %v3376_v33 = vld [vmem:[%s4881_s1 + $0x20] ss:$8 sm:$0xf] }
  0x92   : > { %1392 = vmatprep.subr.mxu0 %v3109_v0 }
  0x93   : > { %v774_v44 = vpop.permute.xlu0 %773  ;;  %1459 = vmatprep.subr.mxu1 %v902_v41  ;;  %v826_v45 = vpop.permute.xlu1 %825  ;;  %1393 = vmatpush1.msra.mxu0 %v3112_v1 }
  0x94   : > { %v782_v46 = vsel %vm779_vm3, %v772_v35, %v774_v44  ;;  %v828_v47 = vsel %vm827_vm1, %v824_v25, %v826_v45  ;;  %v831_v48 = vsel %vm827_vm1, %v826_v45, %v820_v26  ;;  %1460 = vmatpush1.msra.mxu1 %v901_v42  ;;  %v662_v25 = vrot.slane %v3354_v14, %v3238_v7 }
  0x95   : > { %957 = vrot.lane.b32.xlu0 %v3130_v3, %s3060_s19  ;;  %913 = vrot.lane.b32.xlu1 %v3130_v3, %s3061_s14  ;;  %v808_v50 = vmul.f32 %v794_v36, %v782_v46  ;;  %v858_v51 = vmul.f32 %v850_v40, %v831_v48  ;;  %v857_v52 = vmul.f32 %v846_v43, %v828_v47 }
  0x96   : > { %v618_v42 = vrot.slane %v3376_v33, %v3238_v7  ;;  %v614_v47 = vrot.slane %v3376_v33, %v3240_v8  ;;  %v714_v48 = vrot.slane %v3333_v60, %v3259_v19 }
  0x97   : > { %v778_v54 = vpop.permute.xlu0 %777  ;;  %1394 = vmatprep.subr.mxu0 %v808_v50  ;;  %1461 = vmatprep.subr.mxu1 %v858_v51  ;;  %v728_v55 = vpop.permute.xlu1 %727  ;;  %v3401_v50 = vld [vmem:[%s4881_s1 + $0x7] ss:$8 sm:$0xf] }
  0x98   : > { %v783_v56 = vsel %vm779_vm3, %v778_v54, %v772_v35  ;;  %1462 = vmatpush1.msra.mxu1 %v857_v52 }
  0x99   : > { %v807_v57 = vmul.f32 %v790_v49, %v783_v56  ;;  %1463 = vmatprep.subr.mxu1 %v3130_v3  ;;  %v710_v49 = vrot.slane %v3333_v60, %v3257_v18 }
  0x9a   : > { %1464 = vmatpush1.msra.mxu1 %v3119_v2 }
  0x9b   : > { %v730_v61 = vpop.permute.xlu0 %729  ;;  %1395 = vmatpush1.msra.mxu0 %v807_v57  ;;  %v734_v62 = vpop.permute.xlu1 %733 }
  0x9c   : > { %v738_v63 = vsel %vm735_vm4, %v728_v55, %v730_v61  ;;  %v739_v0 = vsel %vm735_vm4, %v734_v62, %v728_v55 }
  0x9d   : > { %v764_v1 = vmul.f32 %v750_v58, %v738_v63  ;;  %v763_v3 = vmul.f32 %v746_v59, %v739_v0  ;;  %v574_v59 = vrot.slane %v3401_v50, %v3238_v7  ;;  %v570_v0 = vrot.slane %v3401_v50, %v3240_v8 }
  0x9f   : > { %v684_v5 = vpop.permute.xlu0 %683  ;;  %1396 = vmatprep.subr.mxu0 %v764_v1  ;;  %v686_v9 = vpop.permute.xlu1 %685  ;;  %v670_v1 = vrot.slane %v3354_v14, %v3259_v19 }
  0xa0   : > { %v694_v2 = vsel %vm691_vm5, %v684_v5, %v686_v9  ;;  %1397 = vmatpush1.msra.mxu0 %v763_v3  ;;  %v666_v3 = vrot.slane %v3354_v14, %v3257_v18 }
  0xa1   : > { %v720_v10 = vmul.f32 %v706_v4, %v694_v2  ;;  %v3429_v4 = vld [vmem:[%s4881_s1 + $0x6] ss:$8 sm:$0xf] }
  0xa3   : > { %v776_v15 = vpop.permute.xlu0 %775  ;;  %1398 = vmatprep.subr.mxu0 %v720_v10  ;;  %v690_v16 = vpop.permute.xlu1 %689 }
  0xa4   : > { %v780_v17 = vsel %vm779_vm3, %v776_v15, %v778_v54  ;;  %v781_v20 = vsel %vm779_vm3, %v774_v44, %v776_v15  ;;  %v695_v21 = vsel %vm691_vm5, %v690_v16, %v684_v5  ;;  %v530_v15 = vrot.slane %v3429_v4, %v3238_v7 }
  0xa5   : > { %v719_v22 = vmul.f32 %v702_v11, %v695_v21  ;;  %v810_v23 = vmul.f32 %v802_v12, %v780_v17  ;;  %v809_v24 = vmul.f32 %v798_v13, %v781_v20 }
  0xa7   : > { %v640_v26 = vpop.permute.xlu0 %639  ;;  %1399 = vmatpush1.msra.mxu0 %v719_v22  ;;  %1465 = vmatprep.subr.mxu1 %v810_v23  ;;  %v642_v27 = vpop.permute.xlu1 %641  ;;  %v526_v22 = vrot.slane %v3429_v4, %v3240_v8  ;;  %v626_v23 = vrot.slane %v3376_v33, %v3259_v19 }
  0xa8   : > { %v650_v28 = vsel %vm647_vm6, %v640_v26, %v642_v27  ;;  %1466 = vmatpush1.msra.mxu1 %v809_v24  ;;  %v622_v24 = vrot.slane %v3376_v33, %v3257_v18 }
  0xa9   : > { %v676_v29 = vmul.f32 %v662_v25, %v650_v28  ;;  %v3457_v25 = vld [vmem:[%s4881_s1 + $0x5] ss:$8 sm:$0xf] }
  0xab   : > { %v732_v34 = vpop.permute.xlu0 %731  ;;  %1400 = vmatprep.subr.mxu0 %v676_v29  ;;  %v646_v35 = vpop.permute.xlu1 %645 }
  0xac   : > { %v736_v36 = vsel %vm735_vm4, %v732_v34, %v734_v62  ;;  %v737_v37 = vsel %vm735_vm4, %v730_v61, %v732_v34  ;;  %v651_v38 = vsel %vm647_vm6, %v646_v35, %v640_v26  ;;  %v486_v34 = vrot.slane %v3457_v25, %v3238_v7 }
  0xad   : > { %v675_v39 = vmul.f32 %v658_v30, %v651_v38  ;;  %v766_v40 = vmul.f32 %v758_v31, %v736_v36  ;;  %v765_v41 = vmul.f32 %v754_v32, %v737_v37 }
  0xaf   : > { %v596_v43 = vpop.permute.xlu0 %595  ;;  %1401 = vmatpush1.msra.mxu0 %v675_v39  ;;  %1467 = vmatprep.subr.mxu1 %v766_v40  ;;  %v598_v44 = vpop.permute.xlu1 %597  ;;  %v482_v39 = vrot.slane %v3457_v25, %v3240_v8  ;;  %v582_v40 = vrot.slane %v3401_v50, %v3259_v19 }
  0xb0   : > { %v3389_v45 = vsel %vm603_vm7, %v596_v43, %v598_v44  ;;  %1468 = vmatpush1.msra.mxu1 %v765_v41  ;;  %v578_v41 = vrot.slane %v3401_v50, %v3257_v18 }
  0xb1   : > { %v632_v46 = vmul.f32 %v618_v42, %v3389_v45  ;;  %v3491_v42 = vld [vmem:[%s4881_s1 + $0x4] ss:$8 sm:$0xf] }
  0xb3   : > { %v688_v51 = vpop.permute.xlu0 %687  ;;  %1402 = vmatprep.subr.mxu0 %v632_v46  ;;  %v602_v52 = vpop.permute.xlu1 %601 }
  0xb4   : > { %v692_v53 = vsel %vm691_vm5, %v688_v51, %v690_v16  ;;  %v693_v54 = vsel %vm691_vm5, %v686_v9, %v688_v51  ;;  %v3409_v55 = vsel %vm603_vm7, %v602_v52, %v596_v43 }
  0xb5   : > { %v631_v56 = vmul.f32 %v614_v47, %v3409_v55  ;;  %v722_v57 = vmul.f32 %v714_v48, %v692_v53  ;;  %v721_v58 = vmul.f32 %v710_v49, %v693_v54 }
  0xb7   : > { %v552_v60 = vpop.permute.xlu0 %551  ;;  %1403 = vmatpush1.msra.mxu0 %v631_v56  ;;  %1469 = vmatprep.subr.mxu1 %v722_v57  ;;  %v554_v61 = vpop.permute.xlu1 %553 }
  0xb8   : > { %v3417_v62 = vsel %vm559_vm8, %v552_v60, %v554_v61  ;;  %1470 = vmatpush1.msra.mxu1 %v721_v58  ;;  %v438_v58 = vrot.slane %v3491_v42, %v3240_v8 }
  0xb9   : > { %v588_v63 = vmul.f32 %v574_v59, %v3417_v62  ;;  %v538_v59 = vrot.slane %v3429_v4, %v3259_v19 }
  0xbb   : > { %v644_v5 = vpop.permute.xlu0 %643  ;;  %1404 = vmatprep.subr.mxu0 %v588_v63  ;;  %v558_v9 = vpop.permute.xlu1 %557 }
  0xbc   : > { %v648_v2 = vsel %vm647_vm6, %v644_v5, %v646_v35  ;;  %v649_v10 = vsel %vm647_vm6, %v642_v27, %v644_v5  ;;  %v3437_v11 = vsel %vm559_vm8, %v558_v9, %v552_v60  ;;  %v534_v60 = vrot.slane %v3429_v4, %v3257_v18 }
  0xbd   : > { %v587_v12 = vmul.f32 %v570_v0, %v3437_v11  ;;  %v678_v13 = vmul.f32 %v670_v1, %v648_v2  ;;  %v677_v14 = vmul.f32 %v666_v3, %v649_v10 }
  0xbf   : > { %v508_v16 = vpop.permute.xlu0 %507  ;;  %1405 = vmatpush1.msra.mxu0 %v587_v12  ;;  %1471 = vmatprep.subr.mxu1 %v678_v13  ;;  %v510_v17 = vpop.permute.xlu1 %509 }
  0xc0   : > { %v3445_v20 = vsel %vm515_vm9, %v508_v16, %v510_v17  ;;  %1472 = vmatpush1.msra.mxu1 %v677_v14 }
  0xc1   : > { %v544_v21 = vmul.f32 %v530_v15, %v3445_v20 }
  0xc3   : > { %v600_v26 = vpop.permute.xlu0 %599  ;;  %1406 = vmatprep.subr.mxu0 %v544_v21  ;;  %v514_v27 = vpop.permute.xlu1 %513 }
  0xc4   : > { %v3461_v28 = vsel %vm603_vm7, %v600_v26, %v602_v52  ;;  %v3465_v29 = vsel %vm603_vm7, %v598_v44, %v600_v26  ;;  %v3469_v30 = vsel %vm515_vm9, %v514_v27, %v508_v16  ;;  %v442_v52 = vrot.slane %v3491_v42, %v3238_v7 }
  0xc5   : > { %v543_v31 = vmul.f32 %v526_v22, %v3469_v30  ;;  %v634_v32 = vmul.f32 %v626_v23, %v3461_v28  ;;  %v633_v33 = vmul.f32 %v622_v24, %v3465_v29  ;;  %v490_v16 = vrot.slane %v3457_v25, %v3257_v18  ;;  %v3562_v22 = vld [vmem:[%s4881_s1 + $0x2] ss:$8 sm:$0xf] }
  0xc7   : > { %v464_v35 = vpop.permute.xlu0 %463  ;;  %1407 = vmatpush1.msra.mxu0 %v543_v31  ;;  %1473 = vmatprep.subr.mxu1 %v634_v32  ;;  %v466_v36 = vpop.permute.xlu1 %465 }
  0xc8   : > { %v3479_v37 = vsel %vm471_vm10, %v464_v35, %v466_v36  ;;  %1474 = vmatpush1.msra.mxu1 %v633_v33  ;;  %v354_v33 = vrot.slane %v3562_v22, %v3238_v7 }
  0xc9   : > { %v500_v38 = vmul.f32 %v486_v34, %v3479_v37 }
  0xcb   : > { %v556_v43 = vpop.permute.xlu0 %555  ;;  %1408 = vmatprep.subr.mxu0 %v500_v38  ;;  %v470_v44 = vpop.permute.xlu1 %469 }
  0xcc   : > { %v3495_v46 = vsel %vm559_vm8, %v556_v43, %v558_v9  ;;  %v3499_v47 = vsel %vm559_vm8, %v554_v61, %v556_v43  ;;  %v3503_v48 = vsel %vm471_vm10, %v470_v44, %v464_v35  ;;  %v3525_v61 = vld [vmem:[%s4881_s1 + $0x3] ss:$8 sm:$0xf]  ;;  %v350_v43 = vrot.slane %v3562_v22, %v3240_v8 }
  0xcd   : > { %v499_v49 = vmul.f32 %v482_v39, %v3503_v48  ;;  %v590_v50 = vmul.f32 %v582_v40, %v3495_v46  ;;  %v589_v51 = vmul.f32 %v578_v41, %v3499_v47  ;;  %v398_v2 = vrot.slane %v3525_v61, %v3238_v7 }
  0xce   : > { %v394_v21 = vrot.slane %v3525_v61, %v3240_v8  ;;  %v446_v40 = vrot.slane %v3491_v42, %v3257_v18  ;;  %v450_v41 = vrot.slane %v3491_v42, %v3259_v19 }
  0xcf   : > { %v420_v53 = vpop.permute.xlu0 %419  ;;  %1409 = vmatpush1.msra.mxu0 %v499_v49  ;;  %1475 = vmatprep.subr.mxu1 %v590_v50  ;;  %v422_v54 = vpop.permute.xlu1 %421 }
  0xd0   : > { %v3513_v56 = vsel %vm427_vm11, %v420_v53, %v422_v54  ;;  %1476 = vmatpush1.msra.mxu1 %v589_v51 }
  0xd1   : > { %v456_v57 = vmul.f32 %v442_v52, %v3513_v56 }
  0xd3   : > { %v512_v63 = vpop.permute.xlu0 %511  ;;  %1410 = vmatprep.subr.mxu0 %v456_v57  ;;  %v426_v0 = vpop.permute.xlu1 %425 }
  0xd4   : > { %v3529_v1 = vsel %vm515_vm9, %v512_v63, %v514_v27  ;;  %v3533_v3 = vsel %vm515_vm9, %v510_v17, %v512_v63  ;;  %v3537_v5 = vsel %vm427_vm11, %v426_v0, %v420_v53  ;;  %v494_v17 = vrot.slane %v3457_v25, %v3259_v19 }
  0xd5   : > { %v455_v4 = vmul.f32 %v438_v58, %v3537_v5  ;;  %v546_v9 = vmul.f32 %v538_v59, %v3529_v1  ;;  %v545_v10 = vmul.f32 %v534_v60, %v3533_v3 }
  0xd7   : > { %v376_v12 = vpop.permute.xlu0 %375  ;;  %1411 = vmatpush1.msra.mxu0 %v455_v4  ;;  %1477 = vmatprep.subr.mxu1 %v546_v9  ;;  %v3545_v13 = vpop.permute.xlu1 %377  ;;  %v3637_v4 = vld [vmem:[%s4881_s1 + $0x61] ss:$8 sm:$0xf] }
  0xd8   : > { %v3550_v14 = vsel %vm383_vm12, %v376_v12, %v3545_v13  ;;  %1478 = vmatpush1.msra.mxu1 %v545_v10  ;;  %v406_v10 = vrot.slane %v3525_v61, %v3259_v19 }
  0xd9   : > { %v412_v15 = vmul.f32 %v398_v2, %v3550_v14  ;;  %v402_v2 = vrot.slane %v3525_v61, %v3257_v18  ;;  %v3660_v61 = vld [vmem:[%s4881_s1 + $0x60] ss:$8 sm:$0xf] }
  0xdb   : > { %v468_v23 = vpop.permute.xlu0 %467  ;;  %1412 = vmatprep.subr.mxu0 %v412_v15  ;;  %v382_v24 = vpop.permute.xlu1 %381  ;;  %v3649_v15 = vld [vmem:[%s4881_s1] ss:$8 sm:$0xf] }
  0xdc   : > { %v3566_v26 = vsel %vm471_vm10, %v468_v23, %v470_v44  ;;  %v3570_v27 = vsel %vm471_vm10, %v466_v36, %v468_v23  ;;  %v3574_v25 = vsel %vm383_vm12, %v382_v24, %v376_v12  ;;  %v3599_v44 = vld [vmem:[%s4881_s1 + $0x1] ss:$8 sm:$0xf] }
  0xdd   : > { %v501_v31 = vmul.f32 %v490_v16, %v3570_v27  ;;  %v502_v32 = vmul.f32 %v494_v17, %v3566_v26  ;;  %v411_v34 = vmul.f32 %v394_v21, %v3574_v25  ;;  %v310_v58 = vrot.slane %v3599_v44, %v3238_v7 }
  0xde   : > { %v306_v12 = vrot.slane %v3599_v44, %v3240_v8  ;;  %v314_v21 = vrot.slane %v3599_v44, %v3257_v18 }
  0xdf   : > { %v332_v35 = vpop.permute.xlu0 %331  ;;  %1479 = vmatprep.subr.mxu1 %v502_v32  ;;  %v3582_v38 = vpop.permute.xlu1 %333  ;;  %1413 = vmatpush1.msra.mxu0 %v411_v34  ;;  %v3667_v32 = vld [vmem:[%s4881_s1 + $0x47] ss:$8 sm:$0xf] }
  0xe0   : > { %v3587_v36 = vsel %vm339_vm13, %v332_v35, %v3582_v38  ;;  %1480 = vmatpush1.msra.mxu1 %v501_v31  ;;  %v1160_v31 = vrot.slane %v3667_v32, %v3238_v7 }
  0xe1   : > { %v368_v39 = vmul.f32 %v354_v33, %v3587_v36 }
  0xe3   : > { %v424_v49 = vpop.permute.xlu0 %423  ;;  %1414 = vmatprep.subr.mxu0 %v368_v39  ;;  %v3601_v50 = vpop.permute.xlu1 %337  ;;  %v358_v39 = vrot.slane %v3562_v22, %v3257_v18 }
  0xe4   : > { %v3605_v51 = vsel %vm427_vm11, %v424_v49, %v426_v0  ;;  %v3609_v52 = vsel %vm427_vm11, %v422_v54, %v424_v49  ;;  %v3614_v42 = vsel %vm339_vm13, %v3601_v50, %v332_v35  ;;  %v3632_v0 = vld [vmem:[%s4881_s1 + $0x62] ss:$8 sm:$0xf] }
  0xe5   : > { %v457_v53 = vmul.f32 %v446_v40, %v3609_v52  ;;  %v458_v57 = vmul.f32 %v450_v41, %v3605_v51  ;;  %v367_v59 = vmul.f32 %v350_v43, %v3614_v42  ;;  %v3688_v40 = vld [vmem:[%s4881_s1 + $0x46] ss:$8 sm:$0xf]  ;;  %v1253_v49 = vrot.slane %v3632_v0, %v3238_v7 }
  0xe7   : > { %v288_v60 = vpop.permute.xlu0 %287  ;;  %1481 = vmatprep.subr.mxu1 %v458_v57  ;;  %v3622_v54 = vpop.permute.xlu1 %289  ;;  %1415 = vmatpush1.msra.mxu0 %v367_v59  ;;  %v1191_v57 = vrot.slane %v3660_v61, %v3238_v7 }
  0xe8   : > { %v3627_v63 = vsel %vm4890_vm14, %v288_v60, %v3622_v54  ;;  %1482 = vmatpush1.msra.mxu1 %v457_v53 }
  0xe9   : > { %v324_v9 = vmul.f32 %v310_v58, %v3627_v63  ;;  %v3705_v58 = vld [vmem:[%s4881_s1 + $0x45] ss:$8 sm:$0xf] }
  0xeb   : > { %v380_v16 = vpop.permute.xlu0 %379  ;;  %1416 = vmatprep.subr.mxu0 %v324_v9  ;;  %v3651_v17 = vpop.permute.xlu1 %293  ;;  %v1222_v9 = vrot.slane %v3637_v4, %v3238_v7 }
  0xec   : > { %v3671_v33 = vsel %vm383_vm12, %v380_v16, %v382_v24  ;;  %v3676_v34 = vsel %vm383_vm12, %v3545_v13, %v380_v16  ;;  %v3681_v35 = vsel %vm4890_vm14, %v3651_v17, %v288_v60  ;;  %v266_v13 = vrot.slane %v3649_v15, %v3238_v7  ;;  %v3718_v16 = vld [vmem:[%s4881_s1 + $0x44] ss:$8 sm:$0xf] }
  0xed   : > { %4894 = vst [vmem:[#allocation3_spill] sm:$0xff] %v3681_v35  ;;  %v413_v24 = vmul.f32 %v402_v2, %v3676_v34  ;;  %v414_v41 = vmul.f32 %v406_v10, %v3671_v33  ;;  %v323_v43 = vmul.f32 %v306_v12, %v3681_v35  ;;  %v362_v12 = vrot.slane %v3562_v22, %v3259_v19  ;;  %v3754_v22 = vld [vmem:[%s4881_s1 + $0x43] ss:$8 sm:$0xf] }
  0xee   : > { %v262_v10 = vrot.slane %v3649_v15, %v3240_v8 }
  0xef   : > { %v243_v59 = vpop.permute.xlu0 %242  ;;  %1483 = vmatprep.subr.mxu1 %v414_v41  ;;  %v245_v60 = vpop.permute.xlu1 %244  ;;  %1417 = vmatpush1.msra.mxu0 %v323_v43 }
  0xf0   : > { %v3722_v41 = vsel %vm4889_vm15, %v243_v59, %v245_v60  ;;  %1484 = vmatpush1.msra.mxu1 %v413_v24 }
  0xf1   : > { %4895 = vst [vmem:[#allocation4_spill] sm:$0xff] %v3722_v41  ;;  %v280_v2 = vmul.f32 %v266_v13, %v3722_v41  ;;  %v274_v41 = vrot.slane %v3649_v15, %v3259_v19 }
  0xf3   : > { %v336_v23 = vpop.permute.xlu0 %335  ;;  %1418 = vmatprep.subr.mxu0 %v280_v2  ;;  %v249_v13 = vpop.permute.xlu1 %248 }
  0xf4   : > { %v3761_v53 = vsel %vm339_vm13, %v336_v23, %v3601_v50  ;;  %v3766_v43 = vsel %vm339_vm13, %v3582_v38, %v336_v23  ;;  %v3770_v24 = vsel %vm4889_vm15, %v249_v13, %v243_v59  ;;  %v318_v50 = vrot.slane %v3599_v44, %v3259_v19  ;;  %v3792_v44 = vld [vmem:[%s4881_s1 + $0x42] ss:$8 sm:$0xf] }
  0xf5   : > { %4896 = vst [vmem:[#allocation5_spill] sm:$0xff] %v3761_v53  ;;  %v370_v35 = vmul.f32 %v362_v12, %v3761_v53  ;;  %v369_v23 = vmul.f32 %v358_v39, %v3766_v43  ;;  %v279_v59 = vmul.f32 %v262_v10, %v3770_v24  ;;  %v1267_v39 = vmul.f32 %v1253_v49, %v3465_v29 }
  0xf7   : > { %v292_v53 = vpop.permute.xlu0 %291  ;;  %1485 = vmatprep.subr.mxu1 %v370_v35  ;;  %v247_v38 = vpop.permute.xlu1 %246  ;;  %1419 = vmatpush1.msra.mxu0 %v279_v59  ;;  %v270_v35 = vrot.slane %v3649_v15, %v3257_v18  ;;  %v1044_v15 = vrot.slane %v3754_v22, %v3259_v19 }
  0xf8   : > { %v3800_v10 = vsel %vm4890_vm14, %v292_v53, %v3651_v17  ;;  %v3805_v12 = vsel %vm4890_vm14, %v3622_v54, %v292_v53  ;;  %v3811_v2 = vsel %vm4889_vm15, %v247_v38, %v249_v13  ;;  %v3817_v17 = vsel %vm4889_vm15, %v245_v60, %v247_v38  ;;  %1430 = vmatprep.subr.mxu0 %v1267_v39 }
  0xf9   : > { %v325_v29 = vmul.f32 %v314_v21, %v3805_v12  ;;  %v326_v49 = vmul.f32 %v318_v50, %v3800_v10  ;;  %v4897_v54 = vrot.slane %v3632_v0, %v3240_v8  ;;  %v1001_v13 = vrot.slane %v3792_v44, %v3240_v8  ;;  %1486 = vmatpush1.msra.mxu1 %v369_v23 }
  0xfa   : > { %v1067_v21 = vrot.slane %v3718_v16, %v3238_v7  ;;  %v1236_v50 = vmul.f32 %v1222_v9, %v3499_v47  ;;  %v1071_v60 = vrot.slane %v3718_v16, %v3257_v18  ;;  %v282_v38 = vmul.f32 %v274_v41, %v3811_v2 }
  0xfb   : > { %v1266_v53 = vmul.f32 %v4897_v54, %v3389_v45  ;;  %v3833_v59 = vpop.permute.xlu0 %953  ;;  %v4898_v45 = vrot.slane %v3637_v4, %v3240_v8  ;;  %1487 = vmatprep.subr.mxu1 %v326_v49  ;;  %v3839_v54 = vpop.permute.xlu1 %955  ;;  %v1013_v23 = vrot.slane %v3792_v44, %v3259_v19  ;;  %v281_v47 = vmul.f32 %v270_v35, %v3817_v17 }
  0xfc   : > { %v1205_v9 = vmul.f32 %v1191_v57, %v3533_v3  ;;  %1488 = vmatpush1.msra.mxu1 %v325_v29  ;;  %v1036_v41 = vrot.slane %v3754_v22, %v3238_v7  ;;  %v1174_v35 = vmul.f32 %v1160_v31, %v3570_v27  ;;  %v1040_v3 = vrot.slane %v3754_v22, %v3257_v18  ;;  %v3861_v57 = vld [vmem:[%s4881_s1 + $0x41] ss:$8 sm:$0xf] }
  0xfd   : > { %1431 = vmatpush2.msra.mxu0 %v1266_v53  ;;  %v1235_v39 = vmul.f32 %v4898_v45, %v3417_v62  ;;  %v4899_v62 = vrot.slane %v3660_v61, %v3240_v8  ;;  %1489 = vmatprep.subr.mxu1 %v282_v38  ;;  %v4900_v53 = vrot.slane %v3632_v0, %v3259_v19  ;;  %vm959_vm15 = vcmp.lt.s32.totalorder %v3232_v6, 119 }
  0xfe   : > { %1432 = vmatprep.subr.mxu0 %v1236_v50  ;;  %1490 = vmatpush1.msra.mxu1 %v281_v47  ;;  %v4902_v31 = vrot.slane %v3667_v32, %v3240_v8  ;;  %v4903_v38 = vrot.slane %v3637_v4, %v3259_v19  ;;  %v1009_v47 = vrot.slane %v3792_v44, %v3257_v18  ;;  %vm915_vm14 = vcmp.lt.s32.totalorder %v3232_v6, 120 }
  0xff   : > { %1433 = vmatpush2.msra.mxu0 %v1235_v39  ;;  %v1204_v49 = vmul.f32 %v4899_v62, %v3445_v20  ;;  %v1269_v45 = vmul.f32 %v4900_v53, %v3409_v55  ;;  %v4901_v20 = vrot.slane %v3632_v0, %v3257_v18  ;;  %v1005_v55 = vrot.slane %v3792_v44, %v3238_v7  ;;  %v3869_v27 = vpop.permute.xlu0 %951 }
 0x100   : > { %1434 = vmatprep.subr.mxu0 %v1205_v9  ;;  %v1173_v50 = vmul.f32 %v4902_v31, %v3479_v37  ;;  %v1238_v39 = vmul.f32 %v4903_v38, %v3437_v11  ;;  %v910_v9 = vpop.permute.xlu1 %909  ;;  %v4905_v37 = vrot.slane %v3637_v4, %v3257_v18  ;;  %v3892_v11 = vld [vmem:[%s4881_s1 + $0x40] ss:$8 sm:$0xf]  ;;  %v4907_v4 = vrot.slane %v3660_v61, %v3259_v19 }
 0x101   : > { %v1268_v29 = vmul.f32 %v4901_v20, %v3461_v28  ;;  %1435 = vmatpush2.msra.mxu0 %v1204_v49  ;;  %1501 = vmatprep.subr.mxu1 %v1269_v45  ;;  %v4904_v28 = vrot.slane %v3688_v40, %v3238_v7  ;;  %v974_v49 = vrot.slane %v3861_v57, %v3238_v7 }
 0x102   : > { %1436 = vmatprep.subr.mxu0 %v1174_v35  ;;  %v1237_v62 = vmul.f32 %v4905_v37, %v3495_v46  ;;  %v1207_v46 = vmul.f32 %v4907_v4, %v3469_v30  ;;  %v4908_v45 = vrot.slane %v3705_v58, %v3238_v7  ;;  %v970_v20 = vrot.slane %v3861_v57, %v3240_v8 }
 0x103   : > { %v1143_v0 = vmul.f32 %v4904_v28, %v3609_v52  ;;  %1502 = vmatpush2.msra.mxu1 %v1268_v29  ;;  %1437 = vmatpush2.msra.mxu0 %v1173_v50  ;;  %v4906_v52 = vrot.slane %v3688_v40, %v3240_v8  ;;  %v4910_v31 = vrot.slane %v3705_v58, %v3240_v8  ;;  %v3921_v50 = vpop.permute.xlu0 %911 }
 0x104   : > { %1503 = vmatprep.subr.mxu1 %v1238_v39  ;;  %v1112_v35 = vmul.f32 %v4908_v45, %v3676_v34  ;;  %v930_v34 = vrot.slane %v3892_v11, %v3238_v7  ;;  %v4911_v38 = vrot.slane %v3667_v32, %v3259_v19  ;;  %v926_v28 = vrot.slane %v3892_v11, %v3240_v8 }
 0x105   : > { %v1142_v53 = vmul.f32 %v4906_v52, %v3513_v56  ;;  %1438 = vmatprep.subr.mxu0 %v1143_v0  ;;  %1504 = vmatpush2.msra.mxu1 %v1237_v62  ;;  %v4909_v56 = vrot.slane %v3660_v61, %v3257_v18  ;;  %v1111_v30 = vmul.f32 %v4910_v31, %v3550_v14 }
 0x106   : > { %1505 = vmatprep.subr.mxu1 %v1207_v46  ;;  %v1176_v61 = vmul.f32 %v4911_v38, %v3503_v48  ;;  %v1081_v14 = vmul.f32 %v1067_v21, %v3766_v43  ;;  %v4913_v0 = vrot.slane %v3718_v16, %v3240_v8  ;;  %v978_v48 = vrot.slane %v3861_v57, %v3257_v18 }
 0x107   : > { %v1206_v29 = vmul.f32 %v4909_v56, %v3529_v1  ;;  %1439 = vmatpush2.msra.mxu0 %v1142_v53  ;;  %v4912_v1 = vrot.slane %v3667_v32, %v3257_v18  ;;  %v4915_v43 = vrot.slane %v3705_v58, %v3259_v19  ;;  %v4916_v62 = vrot.slane %v3688_v40, %v3257_v18  ;;  %v908_v53 = vpop.permute.xlu1 %907 }
 0x108   : > { %1440 = vmatprep.subr.mxu0 %v1112_v35  ;;  %v1080_v37 = vmul.f32 %v4913_v0, %v3587_v36  ;;  %v1050_v52 = vmul.f32 %v1036_v41, %v3805_v12  ;;  %v4917_v4 = vrot.slane %v3754_v22, %v3240_v8  ;;  %v1019_v41 = vmul.f32 %v1005_v55, %v3817_v17  ;;  %v4920_v35 = vld [vmem:[#allocation4_spill] sm:$0xff]  ;;  %v958_v55 = vpop.permute.xlu0 %957 }
 0x109   : > { %v1175_v39 = vmul.f32 %v4912_v1, %v3566_v26  ;;  %1506 = vmatpush2.msra.mxu1 %v1206_v29  ;;  %1441 = vmatpush2.msra.mxu0 %v1111_v30  ;;  %v4914_v26 = vrot.slane %v3688_v40, %v3259_v19  ;;  %v1114_v21 = vmul.f32 %v4915_v43, %v3574_v25 }
 0x10a   : > { %1507 = vmatprep.subr.mxu1 %v1176_v61  ;;  %v1144_v36 = vmul.f32 %v4916_v62, %v3605_v51  ;;  %1442 = vmatprep.subr.mxu0 %v1081_v14  ;;  %v961_v25 = vsel %vm959_vm15, %v3833_v59, %v3839_v54  ;;  %v917_v40 = vsel %vm915_vm14, %v910_v9, %v3921_v50 }
 0x10b   : > { %v1145_v32 = vmul.f32 %v4914_v26, %v3537_v5  ;;  %1508 = vmatpush2.msra.mxu1 %v1175_v39  ;;  %v1049_v5 = vmul.f32 %v4917_v4, %v3627_v63  ;;  %1443 = vmatpush2.msra.mxu0 %v1080_v37  ;;  %v4918_v51 = vrot.slane %v3705_v58, %v3257_v18  ;;  %v914_v30 = vpop.permute.xlu1 %913 }
 0x10c   : > { %v962_v63 = vsel %vm959_vm15, %v3869_v27, %v3833_v59  ;;  %1444 = vmatprep.subr.mxu0 %v1050_v52  ;;  %v4919_v46 = vrot.slane %v3718_v16, %v3259_v19  ;;  %v1018_v58 = vmul.f32 %v1001_v13, %v4920_v35  ;;  %v988_v59 = vmul.f32 %v974_v49, %v961_v25 }
 0x10d   : > { %1509 = vmatprep.subr.mxu1 %v1145_v32  ;;  %v1113_v12 = vmul.f32 %v4918_v51, %v3671_v33  ;;  %v4921_v33 = vld [vmem:[#allocation5_spill] sm:$0xff]  ;;  %1445 = vmatpush2.msra.mxu0 %v1049_v5  ;;  %v944_v56 = vmul.f32 %v930_v34, %v917_v40  ;;  %v918_v29 = vsel %vm915_vm14, %v908_v53, %v910_v9 }
 0x10e   : > { %1510 = vmatpush2.msra.mxu1 %v1144_v36  ;;  %v1083_v45 = vmul.f32 %v4919_v46, %v3614_v42  ;;  %v1082_v17 = vmul.f32 %v1071_v60, %v4921_v33  ;;  %1446 = vmatprep.subr.mxu0 %v1019_v41  ;;  %v4922_v42 = vld [vmem:[#allocation3_spill] sm:$0xff]  ;;  %v987_v31 = vmul.f32 %v970_v20, %v962_v63 }
 0x10f   : > { %1511 = vmatprep.subr.mxu1 %v1114_v21  ;;  %v1052_v13 = vmul.f32 %v1044_v15, %v4922_v42  ;;  %v982_v16 = vrot.slane %v3861_v57, %v3259_v19  ;;  %1447 = vmatpush2.msra.mxu0 %v1018_v58  ;;  %v1051_v60 = vmul.f32 %v1040_v3, %v3800_v10  ;;  %v1274_v10 = vld [vmem:[%s4882_s2] sm:$0xff] }
 0x110   : > { %1512 = vmatpush2.msra.mxu1 %v1113_v12  ;;  %v963_v9 = vsel %vm959_vm15, %v958_v55, %v3869_v27  ;;  %v938_v49 = vrot.slane %v3892_v11, %v3259_v19  ;;  %1448 = vmatprep.subr.mxu0 %v988_v59  ;;  %v1021_v15 = vmul.f32 %v1013_v23, %v3770_v24  ;;  %v2985_v58 = vld [vmem:[%s4881_s1 + $0x27] ss:$8 sm:$0xf]  ;;  %v2984_v42 = vld [vmem:[%s4881_s1 + $0x26] ss:$8 sm:$0xf] }
 0x111   : > { %1513 = vmatprep.subr.mxu1 %v1083_v45  ;;  %v943_v57 = vmul.f32 %v926_v28, %v918_v29  ;;  %v960_v22 = vsel %vm959_vm15, %v3839_v54, %v958_v55  ;;  %1449 = vmatpush2.msra.mxu0 %v987_v31  ;;  %v1020_v3 = vmul.f32 %v1009_v47, %v3811_v2 }
 0x112   : > { %1514 = vmatpush2.msra.mxu1 %v1082_v17  ;;  %v934_v27 = vrot.slane %v3892_v11, %v3257_v18  ;;  %v919_v24 = vsel %vm915_vm14, %v914_v30, %v908_v53  ;;  %1450 = vmatprep.subr.mxu0 %v944_v56  ;;  %v990_v54 = vmul.f32 %v982_v16, %v963_v9 }
 0x113   : > { %1515 = vmatprep.subr.mxu1 %v1052_v13  ;;  %v916_v23 = vsel %vm915_vm14, %v3921_v50, %v914_v30  ;;  %1451 = vmatpush2.msra.mxu0 %v943_v57  ;;  %v989_v20 = vmul.f32 %v978_v48, %v960_v22  ;;  %v946_v44 = vmul.f32 %v938_v49, %v919_v24 }
 0x114   : > { %1516 = vmatpush2.msra.mxu1 %v1051_v60  ;;  %1453 = vmatmul.mubr.f32.vlgmr.msra.gmra.mxu0 %v1274_v10  ;;  %v945_v2 = vmul.f32 %v934_v27, %v916_v23  ;;  %v2174_v33 = vrot.slane %v2985_v58, %v3238_v7  ;;  %v2170_v29 = vrot.slane %v2985_v58, %v3240_v8 }
 0x115   : > { %1517 = vmatprep.subr.mxu1 %v1021_v15  ;;  %v2128_v9 = vrot.slane %v2984_v42, %v3240_v8  ;;  %v2132_v49 = vrot.slane %v2984_v42, %v3238_v7  ;;  %v2182_v24 = vrot.slane %v2985_v58, %v3259_v19 }
 0x116   : > { %1518 = vmatpush2.msra.mxu1 %v1020_v3 }
 0x117   : > { %1519 = vmatprep.subr.mxu1 %v990_v54  ;;  %v4183_v54 = vld [vmem:[%s4881_s1 + $0x24] ss:$8 sm:$0xf] }
 0x118   : > { %1520 = vmatpush2.msra.mxu1 %v989_v20 }
 0x119   : > { %1521 = vmatprep.subr.mxu1 %v946_v44  ;;  %v2136_v44 = vrot.slane %v2984_v42, %v3257_v18 }
 0x11a   : > { %1522 = vmatpush2.msra.mxu1 %v945_v2  ;;  %v2550_v2 = vld [vmem:[%s4883_s3 + $0x8] sm:$0xff] }
 0x11b   : > { %1524 = vmatmul.mubr.f32.vlgmr.msra.gmra.mxu1 %v1274_v10  ;;  %v2178_v10 = vrot.slane %v2985_v58, %v3257_v18  ;;  %2997 = vmatprep.mubr.msk.f32.mxu0 %vm1384_vm2, %v2550_v2 }
 0x11c   : > { %2998 = vmatprep.mubr.msk.f32.mxu1 %vm1384_vm2, %v2550_v2  ;;  %vm4928_vm2 = vcmp.lt.s32.totalorder %v3232_v6, 73 }
 0x1d4   : > { %v1454_v47 = vpop.f32.mrf.mxu0 }
 0x1d6   : > { %v1456_v11 = vpop.f32.mrf.mxu0 }
 0x1d7   : > { %v1530_v34 = vadd.f32 %v1456_v11, %v1454_v47 }
 0x1db   : > { %v1525_v38 = vpop.f32.mrf.mxu1 }
 0x1dc   : > { %v1531_v61 = vadd.f32 %v1530_v34, %v1525_v38  ;;  %v2140_v34 = vrot.slane %v2984_v42, %v3259_v19 }
 0x1dd   : > { %v1527_v1 = vpop.f32.mrf.mxu1 }
 0x1de   : > { %v1532_v39 = vadd.f32 %v1531_v61, %v1527_v1 }
 0x1e0   : > { %1533 = vadd.xlane.f32.xlu0 %v1532_v39 }
 0x269   : > { %v1534_v50 = vpop.xlane.xlu0 %1533 }
 0x26a   : > { %v1536_v14 = vmul.f32 0.001953125, %v1534_v50 }
 0x26c   : > { %v1537_v28 = vsub.f32 %v1454_v47, %v1536_v14  ;;  %v1538_v0 = vsub.f32 %v1456_v11, %v1536_v14  ;;  %v1539_v37 = vsub.f32 %v1525_v38, %v1536_v14  ;;  %v1540_v48 = vsub.f32 %v1527_v1, %v1536_v14 }
 0x26d   : > { %v2086_v1 = vrot.slane %v4183_v54, %v3238_v7 }
 0x26e   : > { %v1541_v26 = vmul.f32 %v1537_v28, %v1537_v28  ;;  %v1542_v32 = vmul.f32 %v1538_v0, %v1538_v0  ;;  %v1543_v43 = vmul.f32 %v1539_v37, %v1539_v37  ;;  %v1544_v62 = vmul.f32 %v1540_v48, %v1540_v48 }
 0x270   : > { %v1545_v21 = vadd.f32 %v1542_v32, %v1541_v26 }
 0x272   : > { %v1546_v36 = vadd.f32 %v1545_v21, %v1543_v43  ;;  %v2982_v43 = vld [vmem:[%s4881_s1 + $0x23] ss:$8 sm:$0xf] }
 0x274   : > { %v1547_v52 = vadd.f32 %v1546_v36, %v1544_v62 }
 0x276   : > { %1548 = vadd.xlane.f32.xlu1 %v1547_v52 }
 0x2ff   : > { %v1549_v53 = vpop.xlane.xlu1 %1548 }
 0x300   : > { %v1550_v4 = vmul.f32 0.001953125, %v1549_v53  ;;  %v2040_v53 = vrot.slane %v2982_v43, %v3240_v8 }
 0x302   : > { %v1551_v5 = vadd.f32 1e-05, %v1550_v4  ;;  %v2044_v4 = vrot.slane %v2982_v43, %v3238_v7 }
 0x304   : > { %3029 = vrsqrt.f32 %v1551_v5  ;;  %v4228_v5 = vld [vmem:[%s4881_s1 + $0x22] ss:$8 sm:$0xf] }
 0x311   : > { %v3030_v25 = vpop.eup %3029 }
 0x312   : > { %v1554_v40 = vmul.f32 %v3030_v25, %v1538_v0  ;;  %v1555_v51 = vmul.f32 %v3030_v25, %v1539_v37  ;;  %v1553_v12 = vmul.f32 %v3030_v25, %v1537_v28  ;;  %v1556_v45 = vmul.f32 %v3030_v25, %v1540_v48 }
 0x313   : > { %v2082_v37 = vrot.slane %v4183_v54, %v3240_v8 }
 0x314   : > { %v4024_v41 = vmax.f32 %v1554_v40, 0.0  ;;  %v4026_v63 = vmax.f32 %v1555_v51, 0.0  ;;  %v4032_v46 = vmax.f32 %v1553_v12, 0.0  ;;  %v4042_v35 = vmax.f32 %v1556_v45, 0.0 }
 0x315   : > { %v2002_v45 = vrot.slane %v4228_v5, %v3238_v7 }
 0x316   : > { %2157 = vrot.lane.b32.xlu1 %v4026_v63, %s3045_s24  ;;  %2155 = vrot.lane.b32.xlu0 %v4024_v41, %s3045_s24 }
 0x31a   : > { %2113 = vrot.lane.b32.xlu1 %v4024_v41, %s3046_s25  ;;  %2153 = vrot.lane.b32.xlu0 %v4032_v46, %s3045_s24 }
 0x31e   : > { %2111 = vrot.lane.b32.xlu1 %v4032_v46, %s3046_s25  ;;  %2115 = vrot.lane.b32.xlu0 %v4026_v63, %s3046_s25 }
 0x322   : > { %2065 = vrot.lane.b32.xlu1 %v4032_v46, %s3047_s26  ;;  %2159 = vrot.lane.b32.xlu0 %v4042_v35, %s3045_s24 }
 0x326   : > { %2117 = vrot.lane.b32.xlu1 %v4042_v35, %s3046_s25  ;;  %2067 = vrot.lane.b32.xlu0 %v4024_v41, %s3047_s26 }
 0x32a   : > { %2023 = vrot.lane.b32.xlu1 %v4032_v46, %s3048_s27  ;;  %2071 = vrot.lane.b32.xlu0 %v4042_v35, %s3047_s26 }
 0x32e   : > { %2029 = vrot.lane.b32.xlu1 %v4042_v35, %s3048_s27  ;;  %2025 = vrot.lane.b32.xlu0 %v4024_v41, %s3048_s27 }
 0x332   : > { %1983 = vrot.lane.b32.xlu1 %v4024_v41, %s3049_s28  ;;  %1981 = vrot.lane.b32.xlu0 %v4032_v46, %s3049_s28 }
 0x336   : > { %1987 = vrot.lane.b32.xlu1 %v4042_v35, %s3049_s28  ;;  %2069 = vrot.lane.b32.xlu0 %v4026_v63, %s3047_s26 }
 0x33a   : > { %1941 = vrot.lane.b32.xlu1 %v4024_v41, %s3050_s29  ;;  %1939 = vrot.lane.b32.xlu0 %v4032_v46, %s3050_s29 }
 0x33e   : > { %1945 = vrot.lane.b32.xlu1 %v4042_v35, %s3050_s29  ;;  %2027 = vrot.lane.b32.xlu0 %v4026_v63, %s3048_s27 }
 0x342   : > { %1899 = vrot.lane.b32.xlu1 %v4024_v41, %s3051_s30  ;;  %1897 = vrot.lane.b32.xlu0 %v4032_v46, %s3051_s30 }
 0x346   : > { %1903 = vrot.lane.b32.xlu1 %v4042_v35, %s3051_s30  ;;  %1985 = vrot.lane.b32.xlu0 %v4026_v63, %s3049_s28 }
 0x34a   : > { %1857 = vrot.lane.b32.xlu1 %v4024_v41, %s3052_s6  ;;  %1855 = vrot.lane.b32.xlu0 %v4032_v46, %s3052_s6 }
 0x34e   : > { %1861 = vrot.lane.b32.xlu1 %v4042_v35, %s3052_s6  ;;  %1943 = vrot.lane.b32.xlu0 %v4026_v63, %s3050_s29 }
 0x352   : > { %1815 = vrot.lane.b32.xlu1 %v4024_v41, %s3053_s7  ;;  %1813 = vrot.lane.b32.xlu0 %v4032_v46, %s3053_s7 }
 0x356   : > { %1819 = vrot.lane.b32.xlu1 %v4042_v35, %s3053_s7  ;;  %1901 = vrot.lane.b32.xlu0 %v4026_v63, %s3051_s30 }
 0x35a   : > { %1773 = vrot.lane.b32.xlu1 %v4024_v41, %s3054_s8  ;;  %1771 = vrot.lane.b32.xlu0 %v4032_v46, %s3054_s8 }
 0x35e   : > { %1777 = vrot.lane.b32.xlu1 %v4042_v35, %s3054_s8  ;;  %1859 = vrot.lane.b32.xlu0 %v4026_v63, %s3052_s6 }
 0x362   : > { %1731 = vrot.lane.b32.xlu1 %v4024_v41, %s3055_s9  ;;  %1729 = vrot.lane.b32.xlu0 %v4032_v46, %s3055_s9 }
 0x366   : > { %1735 = vrot.lane.b32.xlu1 %v4042_v35, %s3055_s9  ;;  %1817 = vrot.lane.b32.xlu0 %v4026_v63, %s3053_s7 }
 0x36a   : > { %1689 = vrot.lane.b32.xlu1 %v4024_v41, %s3056_s10  ;;  %1687 = vrot.lane.b32.xlu0 %v4032_v46, %s3056_s10 }
 0x36e   : > { %1693 = vrot.lane.b32.xlu1 %v4042_v35, %s3056_s10  ;;  %1775 = vrot.lane.b32.xlu0 %v4026_v63, %s3054_s8 }
 0x372   : > { %1647 = vrot.lane.b32.xlu1 %v4024_v41, %s3057_s11  ;;  %1645 = vrot.lane.b32.xlu0 %v4032_v46, %s3057_s11 }
 0x376   : > { %1651 = vrot.lane.b32.xlu1 %v4042_v35, %s3057_s11  ;;  %1733 = vrot.lane.b32.xlu0 %v4026_v63, %s3055_s9 }
 0x37a   : > { %1605 = vrot.lane.b32.xlu1 %v4024_v41, %s3058_s12  ;;  %1603 = vrot.lane.b32.xlu0 %v4032_v46, %s3058_s12 }
 0x37e   : > { %1609 = vrot.lane.b32.xlu1 %v4042_v35, %s3058_s12  ;;  %1691 = vrot.lane.b32.xlu0 %v4026_v63, %s3056_s10 }
 0x382   : > { %1563 = vrot.lane.b32.xlu1 %v4024_v41, %s3059_s13  ;;  %1561 = vrot.lane.b32.xlu0 %v4032_v46, %s3059_s13 }
 0x386   : > { %1567 = vrot.lane.b32.xlu1 %v4042_v35, %s3059_s13  ;;  %1649 = vrot.lane.b32.xlu0 %v4026_v63, %s3057_s11 }
 0x388   : > { %v2158_v17 = vpop.permute.xlu1 %2157  ;;  %v2156_v55 = vpop.permute.xlu0 %2155 }
 0x389   : > { %v2162_v59 = vsel %vm871_vm0, %v2156_v55, %v2158_v17 }
 0x38a   : > { %v2188_v56 = vmul.f32 %v2174_v33, %v2162_v59  ;;  %1565 = vrot.lane.b32.xlu1 %v4026_v63, %s3059_s13  ;;  %1607 = vrot.lane.b32.xlu0 %v4026_v63, %s3058_s12  ;;  %v2094_v59 = vrot.slane %v4183_v54, %v3259_v19  ;;  %s237_s13 = scalar_lea.vmem %s4885_s5, %s3100_s20 }
 0x38c   : > { %v2114_v13 = vpop.permute.xlu1 %2113  ;;  %2662 = vmatprep.subr.mxu0 %v2188_v56  ;;  %v2154_v31 = vpop.permute.xlu0 %2153  ;;  %v4247_v56 = vld [vmem:[%s4881_s1 + $0x21] ss:$8 sm:$0xf] }
 0x38d   : > { %v2163_v16 = vsel %vm871_vm0, %v2154_v31, %v2156_v55  ;;  %v2090_v55 = vrot.slane %v4183_v54, %v3257_v18  ;;  %v4266_v54 = vld [vmem:[%s4881_s1 + $0x20] ss:$8 sm:$0xf] }
 0x38e   : > { %v2187_v60 = vmul.f32 %v2170_v29, %v2163_v16  ;;  %2241 = vrot.lane.b32.xlu1 %v4026_v63, %s3060_s19  ;;  %2239 = vrot.lane.b32.xlu0 %v4024_v41, %s3060_s19 }
 0x390   : > { %v2112_v30 = vpop.permute.xlu1 %2111  ;;  %2663 = vmatpush1.msra.mxu0 %v2187_v60  ;;  %v2116_v15 = vpop.permute.xlu0 %2115 }
 0x391   : > { %v2121_v57 = vsel %vm827_vm1, %v2112_v30, %v2114_v13  ;;  %v2120_v22 = vsel %vm827_vm1, %v2114_v13, %v2116_v15 }
 0x392   : > { %v2145_v3 = vmul.f32 %v2128_v9, %v2121_v57  ;;  %v2146_v27 = vmul.f32 %v2132_v49, %v2120_v22  ;;  %2197 = vrot.lane.b32.xlu1 %v4024_v41, %s3061_s14  ;;  %2237 = vrot.lane.b32.xlu0 %v4032_v46, %s3060_s19 }
 0x394   : > { %v2066_v23 = vpop.permute.xlu1 %2065  ;;  %2664 = vmatprep.subr.mxu0 %v2146_v27  ;;  %v2160_v20 = vpop.permute.xlu0 %2159  ;;  %v2048_v27 = vrot.slane %v2982_v43, %v3257_v18 }
 0x395   : > { %v2161_v47 = vsel %vm871_vm0, %v2158_v17, %v2160_v20  ;;  %v2164_v11 = vsel %vm871_vm0, %v2160_v20, %v2154_v31  ;;  %2665 = vmatpush1.msra.mxu0 %v2145_v3  ;;  %v1998_v17 = vrot.slane %v4228_v5, %v3240_v8  ;;  %v1956_v3 = vrot.slane %v4247_v56, %v3240_v8 }
 0x396   : > { %v2189_v38 = vmul.f32 %v2178_v10, %v2161_v47  ;;  %v2190_v61 = vmul.f32 %v2182_v24, %v2164_v11  ;;  %2195 = vrot.lane.b32.xlu1 %v4032_v46, %s3061_s14  ;;  %2199 = vrot.lane.b32.xlu0 %v4026_v63, %s3061_s14  ;;  %v2052_v24 = vrot.slane %v2982_v43, %v3259_v19  ;;  %vm4924_vm0 = vcmp.lt.s32.totalorder %v3232_v6, 72 }
 0x397   : > { %2666 = vmatprep.subr.mxu0 %v4024_v41 }
 0x398   : > { %2667 = vmatpush1.msra.mxu0 %v4032_v46  ;;  %v2118_v39 = vpop.permute.xlu1 %2117  ;;  %2733 = vmatprep.subr.mxu1 %v2190_v61  ;;  %v2068_v50 = vpop.permute.xlu0 %2067  ;;  %v1918_v61 = vrot.slane %v4266_v54, %v3238_v7 }
 0x399   : > { %v2119_v14 = vsel %vm827_vm1, %v2116_v15, %v2118_v39  ;;  %v2122_v28 = vsel %vm827_vm1, %v2118_v39, %v2112_v30  ;;  %v2075_v0 = vsel %vm779_vm3, %v2066_v23, %v2068_v50  ;;  %2734 = vmatpush1.msra.mxu1 %v2189_v38  ;;  %v1960_v30 = vrot.slane %v4247_v56, %v3238_v7  ;;  %vm4925_vm1 = vmmov %vm4924_vm0 }
 0x39a   : > { %v2147_v48 = vmul.f32 %v2136_v44, %v2119_v14  ;;  %v2148_v26 = vmul.f32 %v2140_v34, %v2122_v28  ;;  %v2100_v32 = vmul.f32 %v2086_v1, %v2075_v0  ;;  %2201 = vrot.lane.b32.xlu1 %v4042_v35, %s3061_s14  ;;  %2243 = vrot.lane.b32.xlu0 %v4042_v35, %s3060_s19 }
 0x39b   : > { %v1914_v28 = vrot.slane %v4266_v54, %v3240_v8  ;;  %v2006_v0 = vrot.slane %v4228_v5, %v3257_v18 }
 0x39c   : > { %v2024_v21 = vpop.permute.xlu1 %2023  ;;  %2668 = vmatprep.subr.mxu0 %v2100_v32  ;;  %2735 = vmatprep.subr.mxu1 %v2148_v26  ;;  %v2072_v62 = vpop.permute.xlu0 %2071 }
 0x39d   : > { %v2076_v36 = vsel %vm779_vm3, %v2072_v62, %v2066_v23  ;;  %2736 = vmatpush1.msra.mxu1 %v2147_v48  ;;  %v4290_v48 = vld [vmem:[%s4881_s1 + $0x7] ss:$8 sm:$0xf] }
 0x39e   : > { %v2099_v52 = vmul.f32 %v2082_v37, %v2076_v36  ;;  %2737 = vmatprep.subr.mxu1 %v4042_v35  ;;  %v2010_v37 = vrot.slane %v4228_v5, %v3259_v19 }
 0x39f   : > { %2738 = vmatpush1.msra.mxu1 %v4026_v63 }
 0x3a0   : > { %v2030_v25 = vpop.permute.xlu1 %2029  ;;  %2669 = vmatpush1.msra.mxu0 %v2099_v52  ;;  %v2026_v40 = vpop.permute.xlu0 %2025 }
 0x3a1   : > { %v2034_v51 = vsel %vm735_vm4, %v2030_v25, %v2024_v21  ;;  %v2033_v12 = vsel %vm735_vm4, %v2024_v21, %v2026_v40 }
 0x3a2   : > { %v2057_v41 = vmul.f32 %v2040_v53, %v2034_v51  ;;  %v2058_v46 = vmul.f32 %v2044_v4, %v2033_v12  ;;  %v1876_v4 = vrot.slane %v4290_v48, %v3238_v7  ;;  %v1872_v12 = vrot.slane %v4290_v48, %v3240_v8 }
 0x3a4   : > { %v1984_v63 = vpop.permute.xlu1 %1983  ;;  %2670 = vmatprep.subr.mxu0 %v2058_v46  ;;  %v1982_v35 = vpop.permute.xlu0 %1981  ;;  %v1968_v46 = vrot.slane %v4247_v56, %v3259_v19 }
 0x3a5   : > { %v1991_v58 = vsel %vm691_vm5, %v1982_v35, %v1984_v63  ;;  %2671 = vmatpush1.msra.mxu0 %v2057_v41  ;;  %v1964_v41 = vrot.slane %v4247_v56, %v3257_v18 }
 0x3a6   : > { %v2016_v33 = vmul.f32 %v2002_v45, %v1991_v58  ;;  %v4317_v45 = vld [vmem:[%s4881_s1 + $0x6] ss:$8 sm:$0xf] }
 0x3a8   : > { %v1988_v29 = vpop.permute.xlu1 %1987  ;;  %2672 = vmatprep.subr.mxu0 %v2016_v33  ;;  %v2070_v42 = vpop.permute.xlu0 %2069 }
 0x3a9   : > { %v1992_v13 = vsel %vm691_vm5, %v1988_v29, %v1982_v35  ;;  %v2073_v31 = vsel %vm779_vm3, %v2070_v42, %v2072_v62  ;;  %v2074_v16 = vsel %vm779_vm3, %v2068_v50, %v2070_v42  ;;  %vm4929_vm3 = vmmov %vm4928_vm2 }
 0x3aa   : > { %v2015_v60 = vmul.f32 %v1998_v17, %v1992_v13  ;;  %v2101_v9 = vmul.f32 %v2090_v55, %v2074_v16  ;;  %v2102_v49 = vmul.f32 %v2094_v59, %v2073_v31 }
 0x3ac   : > { %v1942_v15 = vpop.permute.xlu1 %1941  ;;  %2673 = vmatpush1.msra.mxu0 %v2015_v60  ;;  %2739 = vmatprep.subr.mxu1 %v2102_v49  ;;  %v1940_v57 = vpop.permute.xlu0 %1939  ;;  %v1830_v60 = vrot.slane %v4317_v45, %v3240_v8  ;;  %v1926_v49 = vrot.slane %v4266_v54, %v3259_v19 }
 0x3ad   : > { %v1949_v22 = vsel %vm647_vm6, %v1940_v57, %v1942_v15  ;;  %2740 = vmatpush1.msra.mxu1 %v2101_v9  ;;  %v1922_v9 = vrot.slane %v4266_v54, %v3257_v18 }
 0x3ae   : > { %v1974_v10 = vmul.f32 %v1960_v30, %v1949_v22  ;;  %v4344_v30 = vld [vmem:[%s4881_s1 + $0x5] ss:$8 sm:$0xf] }
 0x3b0   : > { %v1946_v23 = vpop.permute.xlu1 %1945  ;;  %2674 = vmatprep.subr.mxu0 %v1974_v10  ;;  %v2028_v20 = vpop.permute.xlu0 %2027 }
 0x3b1   : > { %v1950_v44 = vsel %vm647_vm6, %v1946_v23, %v1940_v57  ;;  %v2031_v2 = vsel %vm735_vm4, %v2028_v20, %v2030_v25  ;;  %v2032_v47 = vsel %vm735_vm4, %v2026_v40, %v2028_v20  ;;  %vm4930_vm4 = vmmov %vm4924_vm0 }
 0x3b2   : > { %v1973_v11 = vmul.f32 %v1956_v3, %v1950_v44  ;;  %v2059_v34 = vmul.f32 %v2048_v27, %v2032_v47  ;;  %v2060_v38 = vmul.f32 %v2052_v24, %v2031_v2 }
 0x3b4   : > { %v1900_v1 = vpop.permute.xlu1 %1899  ;;  %2675 = vmatpush1.msra.mxu0 %v1973_v11  ;;  %2741 = vmatprep.subr.mxu1 %v2060_v38  ;;  %v1898_v39 = vpop.permute.xlu0 %1897  ;;  %v1788_v11 = vrot.slane %v4344_v30, %v3240_v8  ;;  %v1884_v38 = vrot.slane %v4290_v48, %v3259_v19 }
 0x3b5   : > { %v4278_v50 = vsel %vm603_vm7, %v1898_v39, %v1900_v1  ;;  %2742 = vmatpush1.msra.mxu1 %v2059_v34  ;;  %v1880_v34 = vrot.slane %v4290_v48, %v3257_v18 }
 0x3b6   : > { %v1932_v14 = vmul.f32 %v1918_v61, %v4278_v50  ;;  %v4377_v61 = vld [vmem:[%s4881_s1 + $0x4] ss:$8 sm:$0xf] }
 0x3b8   : > { %v1904_v26 = vpop.permute.xlu1 %1903  ;;  %2676 = vmatprep.subr.mxu0 %v1932_v14  ;;  %v1986_v32 = vpop.permute.xlu0 %1985 }
 0x3b9   : > { %v4294_v43 = vsel %vm603_vm7, %v1904_v26, %v1898_v39  ;;  %v1989_v21 = vsel %vm691_vm5, %v1986_v32, %v1988_v29  ;;  %v1990_v62 = vsel %vm691_vm5, %v1984_v63, %v1986_v32  ;;  %v1834_v29 = vrot.slane %v4317_v45, %v3238_v7  ;;  %vm4931_vm5 = vmmov %vm4924_vm0 }
 0x3ba   : > { %v1931_v36 = vmul.f32 %v1914_v28, %v4294_v43  ;;  %v2017_v52 = vmul.f32 %v2006_v0, %v1990_v62  ;;  %v2018_v53 = vmul.f32 %v2010_v37, %v1989_v21  ;;  %v1750_v32 = vrot.slane %v4377_v61, %v3238_v7 }
 0x3bc   : > { %v1858_v5 = vpop.permute.xlu1 %1857  ;;  %2677 = vmatpush1.msra.mxu0 %v1931_v36  ;;  %2743 = vmatprep.subr.mxu1 %v2018_v53  ;;  %v1856_v25 = vpop.permute.xlu0 %1855  ;;  %v1746_v53 = vrot.slane %v4377_v61, %v3240_v8 }
 0x3bd   : > { %v4305_v40 = vsel %vm559_vm8, %v1856_v25, %v1858_v5  ;;  %2744 = vmatpush1.msra.mxu1 %v2017_v52 }
 0x3be   : > { %v1890_v51 = vmul.f32 %v1876_v4, %v4305_v40  ;;  %v1838_v4 = vrot.slane %v4317_v45, %v3257_v18 }
 0x3c0   : > { %v1862_v63 = vpop.permute.xlu1 %1861  ;;  %2678 = vmatprep.subr.mxu0 %v1890_v51  ;;  %v1944_v35 = vpop.permute.xlu0 %1943 }
 0x3c1   : > { %v4321_v58 = vsel %vm559_vm8, %v1862_v63, %v1856_v25  ;;  %v1947_v33 = vsel %vm647_vm6, %v1944_v35, %v1946_v23  ;;  %v1948_v17 = vsel %vm647_vm6, %v1942_v15, %v1944_v35  ;;  %v1792_v23 = vrot.slane %v4344_v30, %v3238_v7  ;;  %v4410_v25 = vld [vmem:[%s4881_s1 + $0x3] ss:$8 sm:$0xf]  ;;  %vm4932_vm6 = vmmov %vm4928_vm2 }
 0x3c2   : > { %v1889_v55 = vmul.f32 %v1872_v12, %v4321_v58  ;;  %v1975_v59 = vmul.f32 %v1964_v41, %v1948_v17  ;;  %v1976_v56 = vmul.f32 %v1968_v46, %v1947_v33  ;;  %v1708_v17 = vrot.slane %v4410_v25, %v3238_v7 }
 0x3c4   : > { %v1816_v42 = vpop.permute.xlu1 %1815  ;;  %2679 = vmatpush1.msra.mxu0 %v1889_v55  ;;  %2745 = vmatprep.subr.mxu1 %v1976_v56  ;;  %v1814_v13 = vpop.permute.xlu0 %1813 }
 0x3c5   : > { %v4332_v31 = vsel %vm515_vm9, %v1814_v13, %v1816_v42  ;;  %2746 = vmatpush1.msra.mxu1 %v1975_v59 }
 0x3c6   : > { %v1848_v16 = vmul.f32 %v1834_v29, %v4332_v31 }
 0x3c8   : > { %v1820_v15 = vpop.permute.xlu1 %1819  ;;  %2680 = vmatprep.subr.mxu0 %v1848_v16  ;;  %v1902_v57 = vpop.permute.xlu0 %1901  ;;  %v1800_v16 = vrot.slane %v4344_v30, %v3259_v19 }
 0x3c9   : > { %v4348_v22 = vsel %vm515_vm9, %v1820_v15, %v1814_v13  ;;  %v4352_v10 = vsel %vm603_vm7, %v1902_v57, %v1904_v26  ;;  %v4356_v3 = vsel %vm603_vm7, %v1900_v1, %v1902_v57  ;;  %v1796_v13 = vrot.slane %v4344_v30, %v3257_v18  ;;  %vm4933_vm7 = vmmov %vm4928_vm2 }
 0x3ca   : > { %v1847_v27 = vmul.f32 %v1830_v60, %v4348_v22  ;;  %v1933_v24 = vmul.f32 %v1922_v9, %v4356_v3  ;;  %v1934_v54 = vmul.f32 %v1926_v49, %v4352_v10  ;;  %v4443_v60 = vld [vmem:[%s4881_s1 + $0x2] ss:$8 sm:$0xf] }
 0x3cc   : > { %v1774_v20 = vpop.permute.xlu1 %1773  ;;  %2681 = vmatpush1.msra.mxu0 %v1847_v27  ;;  %2747 = vmatprep.subr.mxu1 %v1934_v54  ;;  %v1772_v44 = vpop.permute.xlu0 %1771 }
 0x3cd   : > { %v4365_v2 = vsel %vm471_vm10, %v1772_v44, %v1774_v20  ;;  %2748 = vmatpush1.msra.mxu1 %v1933_v24 }
 0x3ce   : > { %v1806_v47 = vmul.f32 %v1792_v23, %v4365_v2  ;;  %v1666_v23 = vrot.slane %v4443_v60, %v3238_v7 }
 0x3d0   : > { %v1778_v1 = vpop.permute.xlu1 %1777  ;;  %2682 = vmatprep.subr.mxu0 %v1806_v47  ;;  %v1860_v39 = vpop.permute.xlu0 %1859 }
 0x3d1   : > { %v4381_v14 = vsel %vm471_vm10, %v1778_v1, %v1772_v44  ;;  %v4385_v28 = vsel %vm559_vm8, %v1860_v39, %v1862_v63  ;;  %v4389_v0 = vsel %vm559_vm8, %v1858_v5, %v1860_v39  ;;  %v1842_v5 = vrot.slane %v4317_v45, %v3259_v19  ;;  %v4479_v39 = vld [vmem:[%s4881_s1 + $0x1] ss:$8 sm:$0xf] }
 0x3d2   : > { %v1805_v37 = vmul.f32 %v1788_v11, %v4381_v14  ;;  %v1891_v48 = vmul.f32 %v1880_v34, %v4389_v0  ;;  %v1892_v26 = vmul.f32 %v1884_v38, %v4385_v28  ;;  %v1662_v34 = vrot.slane %v4443_v60, %v3240_v8 }
 0x3d3   : > { %v1754_v38 = vrot.slane %v4377_v61, %v3257_v18 }
 0x3d4   : > { %v1732_v21 = vpop.permute.xlu1 %1731  ;;  %2683 = vmatpush1.msra.mxu0 %v1805_v37  ;;  %2749 = vmatprep.subr.mxu1 %v1892_v26  ;;  %v1730_v62 = vpop.permute.xlu0 %1729 }
 0x3d5   : > { %v4398_v36 = vsel %vm427_vm11, %v1730_v62, %v1732_v21  ;;  %2750 = vmatpush1.msra.mxu1 %v1891_v48 }
 0x3d6   : > { %v1764_v52 = vmul.f32 %v1750_v32, %v4398_v36 }
 0x3d8   : > { %v1736_v51 = vpop.permute.xlu1 %1735  ;;  %2684 = vmatprep.subr.mxu0 %v1764_v52  ;;  %v1818_v12 = vpop.permute.xlu0 %1817 }
 0x3d9   : > { %v4414_v41 = vsel %vm427_vm11, %v1736_v51, %v1730_v62  ;;  %v4418_v46 = vsel %vm515_vm9, %v1818_v12, %v1820_v15  ;;  %v4422_v63 = vsel %vm515_vm9, %v1816_v42, %v1818_v12  ;;  %v1704_v42 = vrot.slane %v4410_v25, %v3240_v8 }
 0x3da   : > { %v1763_v45 = vmul.f32 %v1746_v53, %v4414_v41  ;;  %v1849_v35 = vmul.f32 %v1838_v4, %v4422_v63  ;;  %v1850_v33 = vmul.f32 %v1842_v5, %v4418_v46  ;;  %v1624_v4 = vrot.slane %v4479_v39, %v3238_v7 }
 0x3dc   : > { %v1690_v55 = vpop.permute.xlu1 %1689  ;;  %2685 = vmatpush1.msra.mxu0 %v1763_v45  ;;  %2751 = vmatprep.subr.mxu1 %v1850_v33  ;;  %v1688_v59 = vpop.permute.xlu0 %1687  ;;  %v1620_v45 = vrot.slane %v4479_v39, %v3240_v8  ;;  %v1716_v33 = vrot.slane %v4410_v25, %v3259_v19 }
 0x3dd   : > { %v4431_v56 = vsel %vm383_vm12, %v1688_v59, %v1690_v55  ;;  %2752 = vmatpush1.msra.mxu1 %v1849_v35  ;;  %v1712_v35 = vrot.slane %v4410_v25, %v3257_v18 }
 0x3de   : > { %v1722_v29 = vmul.f32 %v1708_v17, %v4431_v56  ;;  %v4518_v17 = vld [vmem:[%s4881_s1] ss:$8 sm:$0xf] }
 0x3e0   : > { %v1694_v9 = vpop.permute.xlu1 %1693  ;;  %2686 = vmatprep.subr.mxu0 %v1722_v29  ;;  %v1776_v49 = vpop.permute.xlu0 %1775 }
 0x3e1   : > { %v4447_v15 = vsel %vm383_vm12, %v1694_v9, %v1688_v59  ;;  %v4451_v57 = vsel %vm471_vm10, %v1776_v49, %v1778_v1  ;;  %v4455_v27 = vsel %vm471_vm10, %v1774_v20, %v1776_v49  ;;  %v1758_v1 = vrot.slane %v4377_v61, %v3259_v19  ;;  %v4523_v59 = vld [vmem:[%s4881_s1 + $0x62] ss:$8 sm:$0xf] }
 0x3e2   : > { %v1721_v30 = vmul.f32 %v1704_v42, %v4447_v15  ;;  %v1807_v24 = vmul.f32 %v1796_v13, %v4455_v27  ;;  %v1808_v54 = vmul.f32 %v1800_v16, %v4451_v57  ;;  %v4530_v13 = vld [vmem:[%s4881_s1 + $0x61] ss:$8 sm:$0xf] }
 0x3e4   : > { %v4462_v44 = vpop.permute.xlu1 %1647  ;;  %2687 = vmatpush1.msra.mxu0 %v1721_v30  ;;  %2753 = vmatprep.subr.mxu1 %v1808_v54  ;;  %v1646_v47 = vpop.permute.xlu0 %1645  ;;  %v4548_v30 = vld [vmem:[%s4881_s1 + $0x60] ss:$8 sm:$0xf] }
 0x3e5   : > { %v4467_v11 = vsel %vm339_vm13, %v1646_v47, %v4462_v44  ;;  %2754 = vmatpush1.msra.mxu1 %v1807_v24 }
 0x3e6   : > { %v1680_v20 = vmul.f32 %v1666_v23, %v4467_v11 }
 0x3e8   : > { %v4481_v37 = vpop.permute.xlu1 %1651  ;;  %2688 = vmatprep.subr.mxu0 %v1680_v20  ;;  %v1734_v48 = vpop.permute.xlu0 %1733  ;;  %v2494_v20 = vrot.slane %v4530_v13, %v3240_v8 }
 0x3e9   : > { %v4486_v26 = vsel %vm339_vm13, %v4481_v37, %v1646_v47  ;;  %v4490_v32 = vsel %vm427_vm11, %v1734_v48, %v1736_v51  ;;  %v4494_v61 = vsel %vm427_vm11, %v1732_v21, %v1734_v48  ;;  %v1582_v47 = vrot.slane %v4518_v17, %v3238_v7 }
 0x3ea   : > { %4923 = vst [vmem:[#allocation4_spill] sm:$0xff] %v4486_v26  ;;  %v1679_v62 = vmul.f32 %v1662_v34, %v4486_v26  ;;  %v1765_v52 = vmul.f32 %v1754_v38, %v4494_v61  ;;  %v1766_v53 = vmul.f32 %v1758_v1, %v4490_v32  ;;  %v4566_v38 = vld [vmem:[%s4881_s1 + $0x47] ss:$8 sm:$0xf] }
 0x3ec   : > { %v4501_v5 = vpop.permute.xlu1 %1605  ;;  %2689 = vmatpush1.msra.mxu0 %v1679_v62  ;;  %2755 = vmatprep.subr.mxu1 %v1766_v53  ;;  %v1604_v12 = vpop.permute.xlu0 %1603  ;;  %v2528_v53 = vrot.slane %v4523_v59, %v3238_v7  ;;  %v4616_v62 = vld [vmem:[%s4881_s1 + $0x44] ss:$8 sm:$0xf] }
 0x3ed   : > { %v4506_v51 = vsel %vm4924_vm0, %v1604_v12, %v4501_v5  ;;  %2756 = vmatpush1.msra.mxu1 %v1765_v52 }
 0x3ee   : > { %v1638_v21 = vmul.f32 %v1624_v4, %v4506_v51  ;;  %v4577_v4 = vld [vmem:[%s4881_s1 + $0x46] ss:$8 sm:$0xf]  ;;  %v2542_v26 = vmul.f32 %v2528_v53, %v4356_v3 }
 0x3f0   : > { %v4525_v29 = vpop.permute.xlu1 %1609  ;;  %2690 = vmatprep.subr.mxu0 %v1638_v21  ;;  %v1692_v42 = vpop.permute.xlu0 %1691 }
 0x3f1   : > { %v4535_v25 = vsel %vm4925_vm1, %v4525_v29, %v1604_v12  ;;  %v4539_v16 = vsel %vm383_vm12, %v1692_v42, %v1694_v9  ;;  %v4543_v49 = vsel %vm383_vm12, %v1690_v55, %v1692_v42  ;;  %v2524_v9 = vrot.slane %v4523_v59, %v3240_v8 }
 0x3f2   : > { %4926 = vst [vmem:[#allocation5_spill] sm:$0xff] %v4535_v25  ;;  %4927 = vst [vmem:[#allocation3_spill] sm:$0xff] %v4539_v16  ;;  %v1637_v24 = vmul.f32 %v1620_v45, %v4535_v25  ;;  %v1723_v54 = vmul.f32 %v1712_v35, %v4543_v49  ;;  %v1724_v23 = vmul.f32 %v1716_v33, %v4539_v16 }
 0x3f3   : > { %v1578_v45 = vrot.slane %v4518_v17, %v3240_v8  ;;  %v1670_v35 = vrot.slane %v4443_v60, %v3257_v18  ;;  %v1674_v33 = vrot.slane %v4443_v60, %v3259_v19  ;;  %v1628_v16 = vrot.slane %v4479_v39, %v3257_v18 }
 0x3f4   : > { %v1564_v1 = vpop.permute.xlu1 %1563  ;;  %2691 = vmatpush1.msra.mxu0 %v1637_v24  ;;  %2757 = vmatprep.subr.mxu1 %v1724_v23  ;;  %v1562_v48 = vpop.permute.xlu0 %1561  ;;  %v2498_v23 = vrot.slane %v4530_v13, %v3238_v7  ;;  %v2541_v53 = vmul.f32 %v2524_v9, %v4278_v50  ;;  %v2356_v9 = vrot.slane %v4616_v62, %v3259_v19 }
 0x3f5   : > { %v4581_v12 = vsel %vm4928_vm2, %v1562_v48, %v1564_v1  ;;  %2758 = vmatpush1.msra.mxu1 %v1723_v54  ;;  %v2468_v54 = vrot.slane %v4548_v30, %v3238_v7 }
 0x3f6   : > { %v1596_v21 = vmul.f32 %v1582_v47, %v4581_v12  ;;  %v4601_v47 = vld [vmem:[%s4881_s1 + $0x45] ss:$8 sm:$0xf]  ;;  %v2512_v50 = vmul.f32 %v2498_v23, %v4389_v0 }
 0x3f7   : > { %v2374_v55 = vrot.slane %v4601_v47, %v3240_v8  ;;  %v2482_v23 = vmul.f32 %v2468_v54, %v4422_v63  ;;  %v4934_v63 = vrot.slane %v4548_v30, %v3240_v8  ;;  %v2378_v54 = vrot.slane %v4601_v47, %v3238_v7 }
 0x3f8   : > { %v1568_v42 = vpop.permute.xlu1 %1567  ;;  %2692 = vmatprep.subr.mxu0 %v1596_v21  ;;  %v1650_v24 = vpop.permute.xlu0 %1649 }
 0x3f9   : > { %v4620_v60 = vsel %vm4929_vm3, %v1568_v42, %v1562_v48  ;;  %v4625_v34 = vsel %vm339_vm13, %v1650_v24, %v4481_v37  ;;  %v4630_v21 = vsel %vm339_vm13, %v4462_v44, %v1650_v24  ;;  %v1632_v44 = vrot.slane %v4479_v39, %v3259_v19  ;;  %v4654_v37 = vld [vmem:[%s4881_s1 + $0x43] ss:$8 sm:$0xf] }
 0x3fa   : > { %v1595_v52 = vmul.f32 %v1578_v45, %v4620_v60  ;;  %v1681_v25 = vmul.f32 %v1670_v35, %v4630_v21  ;;  %v1682_v48 = vmul.f32 %v1674_v33, %v4625_v34  ;;  %v2438_v24 = vrot.slane %v4566_v38, %v3238_v7 }
 0x3fb   : > { %v1590_v39 = vrot.slane %v4518_v17, %v3259_v19 }
 0x3fc   : > { %v1566_v33 = vpop.permute.xlu1 %1565  ;;  %2693 = vmatpush1.msra.mxu0 %v1595_v52  ;;  %2759 = vmatprep.subr.mxu1 %v1682_v48  ;;  %v1608_v3 = vpop.permute.xlu0 %1607  ;;  %v1586_v48 = vrot.slane %v4518_v17, %v3257_v18  ;;  %v2408_v17 = vrot.slane %v4577_v4, %v3238_v7 }
 0x3fd   : > { %v4661_v45 = vsel %vm4930_vm4, %v1608_v3, %v4525_v29  ;;  %v4666_v52 = vsel %vm4931_vm5, %v4501_v5, %v1608_v3  ;;  %2704 = vmatprep.subr.mxu0 %v2542_v26  ;;  %v4675_v35 = vsel %vm4932_vm6, %v1566_v33, %v1568_v42  ;;  %2760 = vmatpush1.msra.mxu1 %v1681_v25  ;;  %v4694_v25 = vld [vmem:[%s4881_s1 + $0x42] ss:$8 sm:$0xf] }
 0x3fe   : > { %v2511_v29 = vmul.f32 %v2494_v20, %v4305_v40  ;;  %v4680_v5 = vsel %vm4933_vm7, %v1564_v1, %v1566_v33  ;;  %v1639_v26 = vmul.f32 %v1628_v16, %v4666_v52  ;;  %v1640_v0 = vmul.f32 %v1632_v44, %v4661_v45  ;;  %2705 = vmatpush2.msra.mxu0 %v2541_v53 }
 0x3ff   : > { %v2412_v42 = vrot.slane %v4577_v4, %v3257_v18  ;;  %v2314_v40 = vrot.slane %v4654_v37, %v3240_v8  ;;  %2706 = vmatprep.subr.mxu0 %v2512_v50  ;;  %v2481_v1 = vmul.f32 %v4934_v63, %v4332_v31  ;;  %v1598_v44 = vmul.f32 %v1590_v39, %v4675_v35 }
 0x400   : > { %v4696_v16 = vpop.permute.xlu1 %2241  ;;  %v4698_v20 = vpop.permute.xlu0 %2239  ;;  %2707 = vmatpush2.msra.mxu0 %v2511_v29  ;;  %2761 = vmatprep.subr.mxu1 %v1640_v0  ;;  %v2452_v33 = vmul.f32 %v2438_v24, %v4455_v27  ;;  %v2382_v3 = vrot.slane %v4601_v47, %v3257_v18  ;;  %v1597_v53 = vmul.f32 %v1586_v48, %v4680_v5 }
 0x401   : > { %2708 = vmatprep.subr.mxu0 %v2482_v23  ;;  %2762 = vmatpush1.msra.mxu1 %v1639_v26  ;;  %v4935_v31 = vrot.slane %v4523_v59, %v3259_v19  ;;  %v4936_v39 = vrot.slane %v4566_v38, %v3240_v8  ;;  %v2284_v27 = vrot.slane %v4694_v25, %v3240_v8 }
 0x402   : > { %2709 = vmatpush2.msra.mxu0 %v2481_v1  ;;  %2763 = vmatprep.subr.mxu1 %v1598_v44  ;;  %v4937_v24 = vrot.slane %v4523_v59, %v3257_v18  ;;  %v2422_v26 = vmul.f32 %v2408_v17, %v4494_v61  ;;  %v4939_v63 = vrot.slane %v4577_v4, %v3240_v8  ;;  %v4743_v61 = vld [vmem:[%s4881_s1 + $0x41] ss:$8 sm:$0xf] }
 0x403   : > { %v2544_v50 = vmul.f32 %v4935_v31, %v4294_v43  ;;  %v2451_v29 = vmul.f32 %v4936_v39, %v4365_v2  ;;  %v2348_v43 = vrot.slane %v4616_v62, %v3238_v7  ;;  %2710 = vmatprep.subr.mxu0 %v2452_v33  ;;  %2764 = vmatpush1.msra.mxu1 %v1597_v53 }
 0x404   : > { %v2543_v48 = vmul.f32 %v4937_v24, %v4352_v10  ;;  %v4728_v0 = vpop.permute.xlu0 %2237  ;;  %v4938_v2 = vrot.slane %v4530_v13, %v3259_v19  ;;  %v2421_v59 = vmul.f32 %v4939_v63, %v4398_v36  ;;  %v2352_v10 = vrot.slane %v4616_v62, %v3257_v18  ;;  %v2198_v17 = vpop.permute.xlu1 %2197 }
 0x405   : > { %2711 = vmatpush2.msra.mxu0 %v2451_v29  ;;  %2775 = vmatprep.subr.mxu1 %v2544_v50  ;;  %v2392_v44 = vmul.f32 %v2378_v54, %v4543_v49  ;;  %v2318_v36 = vrot.slane %v4654_v37, %v3238_v7  ;;  %v4941_v33 = vrot.slane %v4548_v30, %v3259_v19 }
 0x406   : > { %v2514_v23 = vmul.f32 %v4938_v2, %v4321_v58  ;;  %v4940_v58 = vrot.slane %v4530_v13, %v3257_v18  ;;  %2712 = vmatprep.subr.mxu0 %v2422_v26  ;;  %2776 = vmatpush2.msra.mxu1 %v2543_v48  ;;  %v2391_v31 = vmul.f32 %v2374_v55, %v4431_v56  ;;  %v4765_v13 = vld [vmem:[%s4881_s1 + $0x40] ss:$8 sm:$0xf] }
 0x407   : > { %v2484_v53 = vmul.f32 %v4941_v33, %v4348_v22  ;;  %2713 = vmatpush2.msra.mxu0 %v2421_v59  ;;  %v4942_v49 = vrot.slane %v4548_v30, %v3257_v18  ;;  %v2362_v54 = vmul.f32 %v2348_v43, %v4630_v21  ;;  %v2258_v56 = vrot.slane %v4743_v61, %v3238_v7 }
 0x408   : > { %v2513_v1 = vmul.f32 %v4940_v58, %v4385_v28  ;;  %v2288_v28 = vrot.slane %v4694_v25, %v3238_v7  ;;  %2777 = vmatprep.subr.mxu1 %v2514_v23  ;;  %2714 = vmatprep.subr.mxu0 %v2392_v44  ;;  %v4943_v55 = vrot.slane %v4566_v38, %v3259_v19  ;;  %v2200_v48 = vpop.permute.xlu0 %2199 }
 0x409   : > { %v2483_v22 = vmul.f32 %v4942_v49, %v4418_v46  ;;  %v4944_v39 = vrot.slane %v4616_v62, %v3240_v8  ;;  %v2254_v46 = vrot.slane %v4743_v61, %v3240_v8  ;;  %2715 = vmatpush2.msra.mxu0 %v2391_v31  ;;  %v4945_v30 = vrot.slane %v4566_v38, %v3257_v18  ;;  %v2196_v38 = vpop.permute.xlu1 %2195 }
 0x40a   : > { %2778 = vmatpush2.msra.mxu1 %v2513_v1  ;;  %v2454_v50 = vmul.f32 %v4943_v55, %v4381_v14  ;;  %v2332_v24 = vmul.f32 %v2318_v36, %v4666_v52  ;;  %v2212_v14 = vrot.slane %v4765_v13, %v3240_v8  ;;  %2716 = vmatprep.subr.mxu0 %v2362_v54  ;;  %v4950_v1 = vld [vmem:[#allocation5_spill] sm:$0xff] }
 0x40b   : > { %v2361_v29 = vmul.f32 %v4944_v39, %v4467_v11  ;;  %2779 = vmatprep.subr.mxu1 %v2484_v53  ;;  %v2453_v21 = vmul.f32 %v4945_v30, %v4451_v57  ;;  %v4946_v11 = vrot.slane %v4577_v4, %v3259_v19  ;;  %v2331_v43 = vmul.f32 %v2314_v40, %v4506_v51 }
 0x40c   : > { %2780 = vmatpush2.msra.mxu1 %v2483_v22  ;;  %v2246_v57 = vsel %vm959_vm15, %v4698_v20, %v4696_v16  ;;  %v2302_v8 = vmul.f32 %v2288_v28, %v4680_v5  ;;  %v2247_v52 = vsel %vm959_vm15, %v4728_v0, %v4698_v20  ;;  %v2423_v51 = vmul.f32 %v2412_v42, %v4490_v32  ;;  %v4948_v32 = vld [vmem:[#allocation3_spill] sm:$0xff]  ;;  %v2244_v58 = vpop.permute.xlu0 %2243 }
 0x40d   : > { %v2424_v26 = vmul.f32 %v4946_v11, %v4414_v41  ;;  %2717 = vmatpush2.msra.mxu0 %v2361_v29  ;;  %2781 = vmatprep.subr.mxu1 %v2454_v50  ;;  %v2216_v41 = vrot.slane %v4765_v13, %v3238_v7  ;;  %v2301_v40 = vmul.f32 %v2284_v27, %v4581_v12  ;;  %v2202_v36 = vpop.permute.xlu1 %2201 }
 0x40e   : > { %2718 = vmatprep.subr.mxu0 %v2332_v24  ;;  %2782 = vmatpush2.msra.mxu1 %v2453_v21  ;;  %v2204_v5 = vsel %vm915_vm14, %v2198_v17, %v2200_v48  ;;  %v4947_v20 = vrot.slane %v4601_v47, %v3259_v19  ;;  %v2326_v7 = vrot.slane %v4654_v37, %v3259_v19 }
 0x40f   : > { %2719 = vmatpush2.msra.mxu0 %v2331_v43  ;;  %2783 = vmatprep.subr.mxu1 %v2424_v26  ;;  %v2272_v23 = vmul.f32 %v2258_v56, %v2246_v57  ;;  %v2205_v4 = vsel %vm915_vm14, %v2196_v38, %v2198_v17  ;;  %v2393_v12 = vmul.f32 %v2382_v3, %v4948_v32 }
 0x410   : > { %v2394_v2 = vmul.f32 %v4947_v20, %v4447_v15  ;;  %2720 = vmatprep.subr.mxu0 %v2302_v8  ;;  %v2322_v42 = vrot.slane %v4654_v37, %v3257_v18  ;;  %v2271_v27 = vmul.f32 %v2254_v46, %v2247_v52  ;;  %2784 = vmatpush2.msra.mxu1 %v2423_v51  ;;  %v4949_v15 = vld [vmem:[#allocation4_spill] sm:$0xff] }
 0x411   : > { %2721 = vmatpush2.msra.mxu0 %v2301_v40  ;;  %v2364_v63 = vmul.f32 %v2356_v9, %v4949_v15  ;;  %v2296_v59 = vrot.slane %v4694_v25, %v3259_v19  ;;  %v2230_v17 = vmul.f32 %v2216_v41, %v2204_v5  ;;  %v2363_v47 = vmul.f32 %v2352_v10, %v4625_v34  ;;  %v2549_v9 = vld [vmem:[%s4883_s3] sm:$0xff] }
 0x412   : > { %2785 = vmatprep.subr.mxu1 %v2394_v2  ;;  %2722 = vmatprep.subr.mxu0 %v2272_v23  ;;  %v2292_v37 = vrot.slane %v4694_v25, %v3257_v18  ;;  %v2229_v3 = vmul.f32 %v2212_v14, %v2205_v4  ;;  %v2334_v44 = vmul.f32 %v2326_v7, %v4950_v1  ;;  %v3033_v4 = vld [vmem:[%s3106_s23] sm:$0xff] }
 0x413   : > { %2786 = vmatpush2.msra.mxu1 %v2393_v12  ;;  %2723 = vmatpush2.msra.mxu0 %v2271_v27  ;;  %v2266_v33 = vrot.slane %v4743_v61, %v3259_v19  ;;  %v2333_v34 = vmul.f32 %v2322_v42, %v4661_v45  ;;  %v2262_v62 = vrot.slane %v4743_v61, %v3257_v18  ;;  %v3034_v12 = vld [vmem:[%s3106_s23 + $0x8] sm:$0xff]  ;;  %v3035_v27 = vld [vmem:[%s3106_s23 + $0x10] sm:$0xff] }
 0x414   : > { %2787 = vmatprep.subr.mxu1 %v2364_v63  ;;  %2724 = vmatprep.subr.mxu0 %v2230_v17  ;;  %v2248_v25 = vsel %vm959_vm15, %v2244_v58, %v4728_v0  ;;  %v2304_v10 = vmul.f32 %v2296_v59, %v4620_v60  ;;  %v2224_v53 = vrot.slane %v4765_v13, %v3259_v19  ;;  %v3036_v63 = vld [vmem:[%s3106_s23 + $0x18] sm:$0xff] }
 0x415   : > { %2788 = vmatpush2.msra.mxu1 %v2363_v47  ;;  %2725 = vmatpush2.msra.mxu0 %v2229_v3  ;;  %v2245_v31 = vsel %vm959_vm15, %v4696_v16, %v2244_v58  ;;  %v2303_v45 = vmul.f32 %v2292_v37, %v4675_v35  ;;  %v2220_v61 = vrot.slane %v4765_v13, %v3257_v18 }
 0x416   : > { %2789 = vmatprep.subr.mxu1 %v2334_v44  ;;  %2727 = vmatmul.mubr.f32.vlgmr.msra.gmra.mxu0 %v2549_v9  ;;  %v2206_v0 = vsel %vm915_vm14, %v2202_v36, %v2196_v38  ;;  %v2203_v60 = vsel %vm915_vm14, %v2200_v48, %v2202_v36  ;;  %v2274_v28 = vmul.f32 %v2266_v33, %v2248_v25 }
 0x417   : > { %2790 = vmatpush2.msra.mxu1 %v2333_v34  ;;  %v2273_v19 = vmul.f32 %v2262_v62, %v2245_v31  ;;  %v2232_v49 = vmul.f32 %v2224_v53, %v2206_v0  ;;  %v2231_v16 = vmul.f32 %v2220_v61, %v2203_v60 }
 0x418   : > { %2791 = vmatprep.subr.mxu1 %v2304_v10 }
 0x419   : > { %2792 = vmatpush2.msra.mxu1 %v2303_v45 }
 0x41a   : > { %2793 = vmatprep.subr.mxu1 %v2274_v28 }
 0x41b   : > { %2794 = vmatpush2.msra.mxu1 %v2273_v19 }
 0x41c   : > { %2795 = vmatprep.subr.mxu1 %v2232_v49 }
 0x41d   : > { %2796 = vmatpush2.msra.mxu1 %v2231_v16 }
 0x41e   : > { %2798 = vmatmul.mubr.f32.vlgmr.msra.gmra.mxu1 %v2549_v9 }
 0x4d6   : > { %v2728_v35 = vpop.f32.mrf.mxu0 }
 0x4d8   : > { %v2730_v18 = vpop.f32.mrf.mxu0 }
 0x4d9   : > { %v2804_v13 = vadd.f32 %v2730_v18, %v2728_v35 }
 0x4de   : > { %v2799_v22 = vpop.f32.mrf.mxu1 }
 0x4df   : > { %v2805_v54 = vadd.f32 %v2804_v13, %v2799_v22 }
 0x4e0   : > { %v2801_v56 = vpop.f32.mrf.mxu1 }
 0x4e1   : > { %v2806_v55 = vadd.f32 %v2805_v54, %v2801_v56 }
 0x4e3   : > { %2807 = vadd.xlane.f32.xlu0 %v2806_v55 }
 0x56c   : > { %v2808_v6 = vpop.xlane.xlu0 %2807 }
 0x56d   : > { %v2809_v50 = vmul.f32 0.001953125, %v2808_v6 }
 0x56f   : > { %v2810_v39 = vsub.f32 %v2728_v35, %v2809_v50  ;;  %v2811_v29 = vsub.f32 %v2730_v18, %v2809_v50  ;;  %v2812_v46 = vsub.f32 %v2799_v22, %v2809_v50  ;;  %v2813_v30 = vsub.f32 %v2801_v56, %v2809_v50 }
 0x571   : > { %v2814_v21 = vmul.f32 %v2810_v39, %v2810_v39  ;;  %v2815_v24 = vmul.f32 %v2811_v29, %v2811_v29  ;;  %v2816_v14 = vmul.f32 %v2812_v46, %v2812_v46  ;;  %v2817_v11 = vmul.f32 %v2813_v30, %v2813_v30 }
 0x573   : > { %v2818_v48 = vadd.f32 %v2815_v24, %v2814_v21 }
 0x575   : > { %v2819_v26 = vadd.f32 %v2818_v48, %v2816_v14 }
 0x577   : > { %v2820_v43 = vadd.f32 %v2819_v26, %v2817_v11 }
 0x579   : > { %2821 = vadd.xlane.f32.xlu1 %v2820_v43 }
 0x602   : > { %v2822_v57 = vpop.xlane.xlu1 %2821 }
 0x603   : > { %v2823_v38 = vmul.f32 0.001953125, %v2822_v57 }
 0x605   : > { %v2824_v8 = vadd.f32 1e-05, %v2823_v38 }
 0x607   : > { %3031 = vrsqrt.f32 %v2824_v8 }
 0x614   : > { %v3032_v52 = vpop.eup %3031 }
 0x615   : > { %v2826_v41 = vmul.f32 %v3032_v52, %v2810_v39  ;;  %v2827_v51 = vmul.f32 %v3032_v52, %v2811_v29  ;;  %v2828_v40 = vmul.f32 %v3032_v52, %v2812_v46  ;;  %v2829_v5 = vmul.f32 %v3032_v52, %v2813_v30 }
 0x617   : > { %v2830_v20 = vmax.f32 %v2826_v41, 0.0  ;;  %v2831_v2 = vmax.f32 %v2827_v51, 0.0  ;;  %v2832_v7 = vmax.f32 %v2828_v40, 0.0  ;;  %v2833_v23 = vmax.f32 %v2829_v5, 0.0 }
 0x619   : > { %2834 = vst [vmem:[%s237_s13] sm:$0xff] %v2830_v20  ;;  %2835 = vst [vmem:[%s237_s13 + $0x8] sm:$0xff] %v2831_v2  ;;  %v2838_v32 = vadd.f32 %v3033_v4, %v2830_v20  ;;  %v2839_v42 = vadd.f32 %v3034_v12, %v2831_v2  ;;  %v2840_v15 = vadd.f32 %v3035_v27, %v2832_v7 }
 0x61a   : > { %2836 = vst [vmem:[%s237_s13 + $0x10] sm:$0xff] %v2832_v7  ;;  %2837 = vst [vmem:[%s237_s13 + $0x18] sm:$0xff] %v2833_v23  ;;  %v2841_v59 = vadd.f32 %v3036_v63, %v2833_v23 }
 0x61b   : > { %2842 = vst [vmem:[%s232_s15] sm:$0xff] %v2838_v32  ;;  %2843 = vst [vmem:[%s232_s15 + $0x8] sm:$0xff] %v2839_v42 }
 0x61c   : > { %2844 = vst [vmem:[%s232_s15 + $0x10] sm:$0xff] %v2840_v15  ;;  %2845 = vst [vmem:[%s232_s15 + $0x18] sm:$0xff] %v2841_v59 }
 0x61d PF: > { %s16_s18 = sadd.s32 1, %s3043_s18  }
 0x61e   : > { %p13_p4 = scmp.ge.s32.totalorder %s16_s18, 4  }
 0x620   :  { %15 = sbr.rel (!%p13_p4) target bundleno = 1 (0x1), region = 103 }

</bundles_post_ra>
